<compile_context>
chip_gen: v5e
topology: v5e:2x2
jax: 0.10.0
libtpu: 0.0.40
codegen_flags: <defaults>
</compile_context>

<pallas_src>
import functools

import jax
import jax.numpy as jnp
from jax import lax
from jax.experimental import pallas as pl
from jax.experimental.pallas import tpu as pltpu

KSIZE = 3  # fixed 3x3 kernels (module default ksize=3, padding=True)


def _fixup_kernel(xpad_ref, w1_ref, w2_ref, vb_ref, out_ref, mpad_ref, *, H, W, C):
    """Fused FixupBasicBlock forward for one image.

    xpad_ref : (1, H+2, (W+2)*C) reflect-padded input in row layout
    w1_ref   : (9, W*C, W*C)     block-diagonal conv1 tap weights
    w2_ref   : (9, W*C, W*C)     block-diagonal conv2 tap weights (scale folded in)
    vb_ref   : (2, W*C)          folded per-lane bias vectors (stage1, stage2)
    out_ref  : (1, H, W*C)
    mpad_ref : (H+2, (W+2)*C)    VMEM scratch: reflect-padded intermediate
    """
    WC = W * C

    def conv(src_ref, w_ref):
        # 9 shifted-slice matmuls on the MXU; output stays (H, W*C) lane-dense.
        acc = jnp.zeros((H, WC), jnp.float32)
        for kh in range(KSIZE):
            for kw in range(KSIZE):
                patch = src_ref[kh:kh + H, kw * C:kw * C + WC]
                acc = acc + jnp.dot(patch.astype(jnp.float32),
                                    w_ref[KSIZE * kh + kw],
                                    preferred_element_type=jnp.float32)
        return acc

    vb = vb_ref[...]                      # (2, W*C)
    x2d = xpad_ref.at[0]                  # (H+2, (W+2)*C) ref view

    # ---- stage 1: mid = relu(conv1(x + bias0) + bias1)  (biases folded in vb[0]) ----
    mid = jnp.maximum(conv(x2d, w1_ref) + vb[0:1, :], 0.0)        # (H, W*C)

    # ---- reflect-pad mid entirely in VMEM (rows first, then cols incl. corners) ----
    mpad_ref[pl.ds(1, H), pl.ds(C, WC)] = mid
    mpad_ref[pl.ds(0, 1), pl.ds(C, WC)] = mid[1:2, :]
    mpad_ref[pl.ds(H + 1, 1), pl.ds(C, WC)] = mid[H - 2:H - 1, :]
    mpad_ref[pl.ds(0, H + 2), pl.ds(0, C)] = mpad_ref[pl.ds(0, H + 2), pl.ds(2 * C, C)]
    mpad_ref[pl.ds(0, H + 2), pl.ds((W + 1) * C, C)] = (
        mpad_ref[pl.ds(0, H + 2), pl.ds((W - 1) * C, C)])

    # ---- stage 2: y = relu(x + scale*conv2(mid + bias2) + bias3) ----
    #      (scale folded into w2; scale*bias2*sum(w2)+bias3 folded in vb[1])
    acc2 = conv(mpad_ref, w2_ref)
    identity = xpad_ref[0, 1:H + 1, C:C + WC].astype(jnp.float32)
    y = jnp.maximum(identity + acc2 + vb[1:2, :], 0.0)
    out_ref[0] = y.astype(out_ref.dtype)


def fixup_basic_block(x_nchw, w1_oihw, w2_oihw, params):
    """params = [bias0, bias1, bias2, bias3, scale] (float32)."""
    N, C, H, W = x_nchw.shape
    K = KSIZE
    WC = W * C
    bias0, bias1, bias2, bias3, scale = (params[i] for i in range(5))

    # -- layout plumbing (tiny, fused by XLA): NCHW -> reflect-padded row layout --
    x_nhwc = jnp.transpose(x_nchw, (0, 2, 3, 1))
    xpad = jnp.pad(x_nhwc, ((0, 0), (1, 1), (1, 1), (0, 0)), mode="reflect")
    xpad_r = xpad.reshape(N, H + 2, (W + 2) * C)

    # -- fold fixup scalars into weights / per-lane bias vectors --
    eye_w = jnp.eye(W, dtype=jnp.float32)

    def blockdiag(w_oihw, gain):
        # (Co,Ci,kh,kw) -> taps (9, Ci, Co), then kron(I_W, W_tap) -> (9, W*C, W*C)
        wt = jnp.transpose(w_oihw, (2, 3, 1, 0)).astype(jnp.float32)
        wt = wt.reshape(K * K, C, C) * gain
        return jnp.einsum("ij,tkl->tikjl", eye_w, wt).reshape(K * K, WC, WC)

    wbd1 = blockdiag(w1_oihw, 1.0)
    wbd2 = blockdiag(w2_oihw, scale)                         # scale folded in

    s1 = jnp.sum(w1_oihw.astype(jnp.float32), axis=(1, 2, 3))  # per-output-channel
    s2 = jnp.sum(w2_oihw.astype(jnp.float32), axis=(1, 2, 3))
    vb = jnp.stack([jnp.tile(bias0 * s1 + bias1, W),
                    jnp.tile(scale * bias2 * s2 + bias3, W)]).astype(jnp.float32)

    kernel = functools.partial(_fixup_kernel, H=H, W=W, C=C)
    out_r = pl.pallas_call(
        kernel,
        out_shape=jax.ShapeDtypeStruct((N, H, WC), x_nchw.dtype),
        grid=(N,),
        in_specs=[
            pl.BlockSpec((1, H + 2, (W + 2) * C), lambda n: (n, 0, 0)),
            pl.BlockSpec((K * K, WC, WC), lambda n: (0, 0, 0)),
            pl.BlockSpec((K * K, WC, WC), lambda n: (0, 0, 0)),
            pl.BlockSpec((2, WC), lambda n: (0, 0)),
        ],
        out_specs=pl.BlockSpec((1, H, WC), lambda n: (n, 0, 0)),
        scratch_shapes=[pltpu.VMEM((H + 2, (W + 2) * C), jnp.float32)],
        compiler_params=pltpu.CompilerParams(dimension_semantics=("parallel",)),
    )(xpad_r, wbd1, wbd2, vb)

    out = out_r.reshape(N, H, W, C)
    return jnp.transpose(out, (0, 3, 1, 2))                  # row layout -> NCHW


def reference(x_nchw, w1_oihw, w2_oihw, params):
    """Pure-JAX reference mirroring the PyTorch forward."""
    bias0, bias1, bias2, bias3, scale = (params[i] for i in range(5))
    x = jnp.transpose(x_nchw, (0, 2, 3, 1))

    def conv(a, w_oihw):
        apad = jnp.pad(a, ((0, 0), (1, 1), (1, 1), (0, 0)), mode="reflect")
        w_hwio = jnp.transpose(w_oihw, (2, 3, 1, 0))
        return lax.conv_general_dilated(
            apad, w_hwio, (1, 1), "VALID",
            dimension_numbers=("NHWC", "HWIO", "NHWC"))

    out = conv(x + bias0, w1_oihw) + bias1
    out = jnp.maximum(out, 0.0) + bias2
    out = conv(out, w2_oihw) * scale + bias3
    out = jnp.maximum(x + out, 0.0)
    return jnp.transpose(out, (0, 3, 1, 2))


if __name__ == "__main__":
    N, C, H, W = 2, 8, 16, 16   # n_features = 8; W*C = 128 -> lane-dense layout

    key = jax.random.PRNGKey(0)
    kx, kw1, kw2 = jax.random.split(key, 3)

    x = jax.random.normal(kx, (N, C, H, W), dtype=jnp.float32)

    # Xavier-uniform (gain=1, activation='none') Conv2d weights, OIHW layout.
    fan = C * KSIZE * KSIZE
    bound = (6.0 / (fan + fan)) ** 0.5
    w1 = jax.random.uniform(kw1, (C, C, KSIZE, KSIZE), jnp.float32, -bound, bound)
    w2 = jax.random.uniform(kw2, (C, C, KSIZE, KSIZE), jnp.float32, -bound, bound)

    # Fixup scalars (learnable parameters; nonzero here to exercise the folding).
    params = jnp.array([0.05, -0.03, 0.02, 0.01, 0.9], dtype=jnp.float32)

    out = jax.jit(fixup_basic_block)(x, w1, w2, params)
    out = jax.block_until_ready(out)

    ref = reference(x, w1, w2, params)
    assert out.shape == (N, C, H, W)
    assert jnp.allclose(out, ref, atol=1e-4, rtol=1e-4), float(jnp.max(jnp.abs(out - ref)))

    print("KERNEL_OK")
</pallas_src>

<mosaic_0001>
module attributes {stable_mosaic.version = 11 : i64} {
  func.func @_fixup_kernel(%arg0: i32, %arg1: memref<1x18x144xf32, #tpu.memory_space<vmem>>, %arg2: memref<9x128x128xf32, #tpu.memory_space<vmem>>, %arg3: memref<9x128x128xf32, #tpu.memory_space<vmem>>, %arg4: memref<2x128xf32, #tpu.memory_space<vmem>>, %arg5: memref<1x16x128xf32, #tpu.memory_space<vmem>>, %arg6: memref<18x144xf32, #tpu.memory_space<vmem>>) attributes {dimension_semantics = [#tpu.dimension_semantics<parallel>], iteration_bounds = array<i64: 2>, scalar_prefetch = 0 : i64, scratch_operands = 1 : i64, tpu.core_type = #tpu.core_type<tc>, window_params = [{transform_indices = @transform_0, window_bounds = array<i64: 1, 18, 144>}, {pipeline_mode = #tpu.pipeline_mode<synchronous>, transform_indices = @transform_1, window_bounds = array<i64: 9, 128, 128>}, {pipeline_mode = #tpu.pipeline_mode<synchronous>, transform_indices = @transform_2, window_bounds = array<i64: 9, 128, 128>}, {pipeline_mode = #tpu.pipeline_mode<synchronous>, transform_indices = @transform_3, window_bounds = array<i64: 2, 128>}, {transform_indices = @transform_4, window_bounds = array<i64: 1, 16, 128>}]} {
    %c0 = arith.constant 0 : index
    %c0_0 = arith.constant 0 : index
    %0 = vector.load %arg4[%c0, %c0_0] : memref<2x128xf32, #tpu.memory_space<vmem>>, vector<2x128xf32>
    %cst = arith.constant 0.000000e+00 : f32
    %1 = vector.broadcast %cst : f32 to vector<16x128xf32>
    %c0_i32 = arith.constant 0 : i32
    %c0_i32_1 = arith.constant 0 : i32
    %c0_i32_2 = arith.constant 0 : i32
    %2 = tpu.memref_slice %arg1[%c0_i32, %c0_i32_1, %c0_i32_2] : memref<1x18x144xf32, #tpu.memory_space<vmem>> -> memref<1x18x144xf32, #tpu.memory_space<vmem>>
    %3 = tpu.memref_squeeze %2 : memref<1x18x144xf32, #tpu.memory_space<vmem>> -> memref<18x144xf32, #tpu.memory_space<vmem>>
    %c0_3 = arith.constant 0 : index
    %c0_4 = arith.constant 0 : index
    %4 = vector.load %3[%c0_3, %c0_4] : memref<18x144xf32, #tpu.memory_space<vmem>>, vector<16x128xf32>
    %c0_5 = arith.constant 0 : index
    %c0_6 = arith.constant 0 : index
    %c0_7 = arith.constant 0 : index
    %5 = vector.load %arg2[%c0_5, %c0_6, %c0_7] : memref<9x128x128xf32, #tpu.memory_space<vmem>>, vector<1x128x128xf32>
    %6 = vector.shape_cast %5 : vector<1x128x128xf32> to vector<128x128xf32>
    %cst_8 = arith.constant dense<0.000000e+00> : vector<16x128xf32>
    %7 = tpu.matmul %4, %6, %cst_8 {dimension_numbers = #tpu.dot_dimension_numbers<[1], [0], [0], [1], [0, 0, 1, 1], [], []>} : vector<16x128xf32>, vector<128x128xf32>, vector<16x128xf32> -> vector<16x128xf32>
    %8 = arith.addf %1, %7 : vector<16x128xf32>
    %c0_i32_9 = arith.constant 0 : i32
    %c0_i32_10 = arith.constant 0 : i32
    %c0_i32_11 = arith.constant 0 : i32
    %9 = tpu.memref_slice %arg1[%c0_i32_9, %c0_i32_10, %c0_i32_11] : memref<1x18x144xf32, #tpu.memory_space<vmem>> -> memref<1x18x144xf32, #tpu.memory_space<vmem>>
    %10 = tpu.memref_squeeze %9 : memref<1x18x144xf32, #tpu.memory_space<vmem>> -> memref<18x144xf32, #tpu.memory_space<vmem>>
    %c0_12 = arith.constant 0 : index
    %c8 = arith.constant 8 : index
    %11 = vector.load %10[%c0_12, %c8] : memref<18x144xf32, #tpu.memory_space<vmem>>, vector<16x128xf32>
    %c1 = arith.constant 1 : index
    %c0_13 = arith.constant 0 : index
    %c0_14 = arith.constant 0 : index
    %12 = vector.load %arg2[%c1, %c0_13, %c0_14] : memref<9x128x128xf32, #tpu.memory_space<vmem>>, vector<1x128x128xf32>
    %13 = vector.shape_cast %12 : vector<1x128x128xf32> to vector<128x128xf32>
    %cst_15 = arith.constant dense<0.000000e+00> : vector<16x128xf32>
    %14 = tpu.matmul %11, %13, %cst_15 {dimension_numbers = #tpu.dot_dimension_numbers<[1], [0], [0], [1], [0, 0, 1, 1], [], []>} : vector<16x128xf32>, vector<128x128xf32>, vector<16x128xf32> -> vector<16x128xf32>
    %15 = arith.addf %8, %14 : vector<16x128xf32>
    %c0_i32_16 = arith.constant 0 : i32
    %c0_i32_17 = arith.constant 0 : i32
    %c0_i32_18 = arith.constant 0 : i32
    %16 = tpu.memref_slice %arg1[%c0_i32_16, %c0_i32_17, %c0_i32_18] : memref<1x18x144xf32, #tpu.memory_space<vmem>> -> memref<1x18x144xf32, #tpu.memory_space<vmem>>
    %17 = tpu.memref_squeeze %16 : memref<1x18x144xf32, #tpu.memory_space<vmem>> -> memref<18x144xf32, #tpu.memory_space<vmem>>
    %c0_19 = arith.constant 0 : index
    %c16 = arith.constant 16 : index
    %18 = vector.load %17[%c0_19, %c16] : memref<18x144xf32, #tpu.memory_space<vmem>>, vector<16x128xf32>
    %c2 = arith.constant 2 : index
    %c0_20 = arith.constant 0 : index
    %c0_21 = arith.constant 0 : index
    %19 = vector.load %arg2[%c2, %c0_20, %c0_21] : memref<9x128x128xf32, #tpu.memory_space<vmem>>, vector<1x128x128xf32>
    %20 = vector.shape_cast %19 : vector<1x128x128xf32> to vector<128x128xf32>
    %cst_22 = arith.constant dense<0.000000e+00> : vector<16x128xf32>
    %21 = tpu.matmul %18, %20, %cst_22 {dimension_numbers = #tpu.dot_dimension_numbers<[1], [0], [0], [1], [0, 0, 1, 1], [], []>} : vector<16x128xf32>, vector<128x128xf32>, vector<16x128xf32> -> vector<16x128xf32>
    %22 = arith.addf %15, %21 : vector<16x128xf32>
    %c0_i32_23 = arith.constant 0 : i32
    %c0_i32_24 = arith.constant 0 : i32
    %c0_i32_25 = arith.constant 0 : i32
    %23 = tpu.memref_slice %arg1[%c0_i32_23, %c0_i32_24, %c0_i32_25] : memref<1x18x144xf32, #tpu.memory_space<vmem>> -> memref<1x18x144xf32, #tpu.memory_space<vmem>>
    %24 = tpu.memref_squeeze %23 : memref<1x18x144xf32, #tpu.memory_space<vmem>> -> memref<18x144xf32, #tpu.memory_space<vmem>>
    %c1_26 = arith.constant 1 : index
    %c0_27 = arith.constant 0 : index
    %25 = vector.load %24[%c1_26, %c0_27] : memref<18x144xf32, #tpu.memory_space<vmem>>, vector<16x128xf32>
    %c3 = arith.constant 3 : index
    %c0_28 = arith.constant 0 : index
    %c0_29 = arith.constant 0 : index
    %26 = vector.load %arg2[%c3, %c0_28, %c0_29] : memref<9x128x128xf32, #tpu.memory_space<vmem>>, vector<1x128x128xf32>
    %27 = vector.shape_cast %26 : vector<1x128x128xf32> to vector<128x128xf32>
    %cst_30 = arith.constant dense<0.000000e+00> : vector<16x128xf32>
    %28 = tpu.matmul %25, %27, %cst_30 {dimension_numbers = #tpu.dot_dimension_numbers<[1], [0], [0], [1], [0, 0, 1, 1], [], []>} : vector<16x128xf32>, vector<128x128xf32>, vector<16x128xf32> -> vector<16x128xf32>
    %29 = arith.addf %22, %28 : vector<16x128xf32>
    %c0_i32_31 = arith.constant 0 : i32
    %c0_i32_32 = arith.constant 0 : i32
    %c0_i32_33 = arith.constant 0 : i32
    %30 = tpu.memref_slice %arg1[%c0_i32_31, %c0_i32_32, %c0_i32_33] : memref<1x18x144xf32, #tpu.memory_space<vmem>> -> memref<1x18x144xf32, #tpu.memory_space<vmem>>
    %31 = tpu.memref_squeeze %30 : memref<1x18x144xf32, #tpu.memory_space<vmem>> -> memref<18x144xf32, #tpu.memory_space<vmem>>
    %c1_34 = arith.constant 1 : index
    %c8_35 = arith.constant 8 : index
    %32 = vector.load %31[%c1_34, %c8_35] : memref<18x144xf32, #tpu.memory_space<vmem>>, vector<16x128xf32>
    %c4 = arith.constant 4 : index
    %c0_36 = arith.constant 0 : index
    %c0_37 = arith.constant 0 : index
    %33 = vector.load %arg2[%c4, %c0_36, %c0_37] : memref<9x128x128xf32, #tpu.memory_space<vmem>>, vector<1x128x128xf32>
    %34 = vector.shape_cast %33 : vector<1x128x128xf32> to vector<128x128xf32>
    %cst_38 = arith.constant dense<0.000000e+00> : vector<16x128xf32>
    %35 = tpu.matmul %32, %34, %cst_38 {dimension_numbers = #tpu.dot_dimension_numbers<[1], [0], [0], [1], [0, 0, 1, 1], [], []>} : vector<16x128xf32>, vector<128x128xf32>, vector<16x128xf32> -> vector<16x128xf32>
    %36 = arith.addf %29, %35 : vector<16x128xf32>
    %c0_i32_39 = arith.constant 0 : i32
    %c0_i32_40 = arith.constant 0 : i32
    %c0_i32_41 = arith.constant 0 : i32
    %37 = tpu.memref_slice %arg1[%c0_i32_39, %c0_i32_40, %c0_i32_41] : memref<1x18x144xf32, #tpu.memory_space<vmem>> -> memref<1x18x144xf32, #tpu.memory_space<vmem>>
    %38 = tpu.memref_squeeze %37 : memref<1x18x144xf32, #tpu.memory_space<vmem>> -> memref<18x144xf32, #tpu.memory_space<vmem>>
    %c1_42 = arith.constant 1 : index
    %c16_43 = arith.constant 16 : index
    %39 = vector.load %38[%c1_42, %c16_43] : memref<18x144xf32, #tpu.memory_space<vmem>>, vector<16x128xf32>
    %c5 = arith.constant 5 : index
    %c0_44 = arith.constant 0 : index
    %c0_45 = arith.constant 0 : index
    %40 = vector.load %arg2[%c5, %c0_44, %c0_45] : memref<9x128x128xf32, #tpu.memory_space<vmem>>, vector<1x128x128xf32>
    %41 = vector.shape_cast %40 : vector<1x128x128xf32> to vector<128x128xf32>
    %cst_46 = arith.constant dense<0.000000e+00> : vector<16x128xf32>
    %42 = tpu.matmul %39, %41, %cst_46 {dimension_numbers = #tpu.dot_dimension_numbers<[1], [0], [0], [1], [0, 0, 1, 1], [], []>} : vector<16x128xf32>, vector<128x128xf32>, vector<16x128xf32> -> vector<16x128xf32>
    %43 = arith.addf %36, %42 : vector<16x128xf32>
    %c0_i32_47 = arith.constant 0 : i32
    %c0_i32_48 = arith.constant 0 : i32
    %c0_i32_49 = arith.constant 0 : i32
    %44 = tpu.memref_slice %arg1[%c0_i32_47, %c0_i32_48, %c0_i32_49] : memref<1x18x144xf32, #tpu.memory_space<vmem>> -> memref<1x18x144xf32, #tpu.memory_space<vmem>>
    %45 = tpu.memref_squeeze %44 : memref<1x18x144xf32, #tpu.memory_space<vmem>> -> memref<18x144xf32, #tpu.memory_space<vmem>>
    %c2_50 = arith.constant 2 : index
    %c0_51 = arith.constant 0 : index
    %46 = vector.load %45[%c2_50, %c0_51] : memref<18x144xf32, #tpu.memory_space<vmem>>, vector<16x128xf32>
    %c6 = arith.constant 6 : index
    %c0_52 = arith.constant 0 : index
    %c0_53 = arith.constant 0 : index
    %47 = vector.load %arg2[%c6, %c0_52, %c0_53] : memref<9x128x128xf32, #tpu.memory_space<vmem>>, vector<1x128x128xf32>
    %48 = vector.shape_cast %47 : vector<1x128x128xf32> to vector<128x128xf32>
    %cst_54 = arith.constant dense<0.000000e+00> : vector<16x128xf32>
    %49 = tpu.matmul %46, %48, %cst_54 {dimension_numbers = #tpu.dot_dimension_numbers<[1], [0], [0], [1], [0, 0, 1, 1], [], []>} : vector<16x128xf32>, vector<128x128xf32>, vector<16x128xf32> -> vector<16x128xf32>
    %50 = arith.addf %43, %49 : vector<16x128xf32>
    %c0_i32_55 = arith.constant 0 : i32
    %c0_i32_56 = arith.constant 0 : i32
    %c0_i32_57 = arith.constant 0 : i32
    %51 = tpu.memref_slice %arg1[%c0_i32_55, %c0_i32_56, %c0_i32_57] : memref<1x18x144xf32, #tpu.memory_space<vmem>> -> memref<1x18x144xf32, #tpu.memory_space<vmem>>
    %52 = tpu.memref_squeeze %51 : memref<1x18x144xf32, #tpu.memory_space<vmem>> -> memref<18x144xf32, #tpu.memory_space<vmem>>
    %c2_58 = arith.constant 2 : index
    %c8_59 = arith.constant 8 : index
    %53 = vector.load %52[%c2_58, %c8_59] : memref<18x144xf32, #tpu.memory_space<vmem>>, vector<16x128xf32>
    %c7 = arith.constant 7 : index
    %c0_60 = arith.constant 0 : index
    %c0_61 = arith.constant 0 : index
    %54 = vector.load %arg2[%c7, %c0_60, %c0_61] : memref<9x128x128xf32, #tpu.memory_space<vmem>>, vector<1x128x128xf32>
    %55 = vector.shape_cast %54 : vector<1x128x128xf32> to vector<128x128xf32>
    %cst_62 = arith.constant dense<0.000000e+00> : vector<16x128xf32>
    %56 = tpu.matmul %53, %55, %cst_62 {dimension_numbers = #tpu.dot_dimension_numbers<[1], [0], [0], [1], [0, 0, 1, 1], [], []>} : vector<16x128xf32>, vector<128x128xf32>, vector<16x128xf32> -> vector<16x128xf32>
    %57 = arith.addf %50, %56 : vector<16x128xf32>
    %c0_i32_63 = arith.constant 0 : i32
    %c0_i32_64 = arith.constant 0 : i32
    %c0_i32_65 = arith.constant 0 : i32
    %58 = tpu.memref_slice %arg1[%c0_i32_63, %c0_i32_64, %c0_i32_65] : memref<1x18x144xf32, #tpu.memory_space<vmem>> -> memref<1x18x144xf32, #tpu.memory_space<vmem>>
    %59 = tpu.memref_squeeze %58 : memref<1x18x144xf32, #tpu.memory_space<vmem>> -> memref<18x144xf32, #tpu.memory_space<vmem>>
    %c2_66 = arith.constant 2 : index
    %c16_67 = arith.constant 16 : index
    %60 = vector.load %59[%c2_66, %c16_67] : memref<18x144xf32, #tpu.memory_space<vmem>>, vector<16x128xf32>
    %c8_68 = arith.constant 8 : index
    %c0_69 = arith.constant 0 : index
    %c0_70 = arith.constant 0 : index
    %61 = vector.load %arg2[%c8_68, %c0_69, %c0_70] : memref<9x128x128xf32, #tpu.memory_space<vmem>>, vector<1x128x128xf32>
    %62 = vector.shape_cast %61 : vector<1x128x128xf32> to vector<128x128xf32>
    %cst_71 = arith.constant dense<0.000000e+00> : vector<16x128xf32>
    %63 = tpu.matmul %60, %62, %cst_71 {dimension_numbers = #tpu.dot_dimension_numbers<[1], [0], [0], [1], [0, 0, 1, 1], [], []>} : vector<16x128xf32>, vector<128x128xf32>, vector<16x128xf32> -> vector<16x128xf32>
    %64 = arith.addf %57, %63 : vector<16x128xf32>
    %65 = vector.extract_strided_slice %0 {offsets = [0, 0], sizes = [1, 128], strides = [1, 1]} : vector<2x128xf32> to vector<1x128xf32>
    %66 = vector.broadcast %65 : vector<1x128xf32> to vector<16x128xf32>
    %67 = arith.addf %64, %66 : vector<16x128xf32>
    %cst_72 = arith.constant 0.000000e+00 : f32
    %68 = vector.broadcast %cst_72 : f32 to vector<16x128xf32>
    %69 = arith.maximumf %67, %68 : vector<16x128xf32>
    %c1_73 = arith.constant 1 : index
    %c8_74 = arith.constant 8 : index
    %70 = vector.load %arg6[%c1_73, %c8_74] : memref<18x144xf32, #tpu.memory_space<vmem>>, vector<16x128xf32>
    tpu.vector_store %arg6[%c1_73, %c8_74], %69 {strides = array<i32>} : memref<18x144xf32, #tpu.memory_space<vmem>>, vector<16x128xf32>,
    %71 = vector.extract_strided_slice %69 {offsets = [1, 0], sizes = [1, 128], strides = [1, 1]} : vector<16x128xf32> to vector<1x128xf32>
    %c0_75 = arith.constant 0 : index
    %c8_76 = arith.constant 8 : index
    %72 = vector.load %arg6[%c0_75, %c8_76] : memref<18x144xf32, #tpu.memory_space<vmem>>, vector<1x128xf32>
    tpu.vector_store %arg6[%c0_75, %c8_76], %71 {strides = array<i32>} : memref<18x144xf32, #tpu.memory_space<vmem>>, vector<1x128xf32>,
    %73 = vector.extract_strided_slice %69 {offsets = [14, 0], sizes = [1, 128], strides = [1, 1]} : vector<16x128xf32> to vector<1x128xf32>
    %c17 = arith.constant 17 : index
    %c8_77 = arith.constant 8 : index
    %74 = vector.load %arg6[%c17, %c8_77] : memref<18x144xf32, #tpu.memory_space<vmem>>, vector<1x128xf32>
    tpu.vector_store %arg6[%c17, %c8_77], %73 {strides = array<i32>} : memref<18x144xf32, #tpu.memory_space<vmem>>, vector<1x128xf32>,
    %c0_78 = arith.constant 0 : index
    %c16_79 = arith.constant 16 : index
    %75 = vector.load %arg6[%c0_78, %c16_79] : memref<18x144xf32, #tpu.memory_space<vmem>>, vector<18x8xf32>
    %c0_80 = arith.constant 0 : index
    %c0_81 = arith.constant 0 : index
    %76 = vector.load %arg6[%c0_80, %c0_81] : memref<18x144xf32, #tpu.memory_space<vmem>>, vector<18x8xf32>
    tpu.vector_store %arg6[%c0_80, %c0_81], %75 {strides = array<i32>} : memref<18x144xf32, #tpu.memory_space<vmem>>, vector<18x8xf32>,
    %c0_82 = arith.constant 0 : index
    %c120 = arith.constant 120 : index
    %77 = vector.load %arg6[%c0_82, %c120] : memref<18x144xf32, #tpu.memory_space<vmem>>, vector<18x8xf32>
    %c0_83 = arith.constant 0 : index
    %c136 = arith.constant 136 : index
    %78 = vector.load %arg6[%c0_83, %c136] : memref<18x144xf32, #tpu.memory_space<vmem>>, vector<18x8xf32>
    tpu.vector_store %arg6[%c0_83, %c136], %77 {strides = array<i32>} : memref<18x144xf32, #tpu.memory_space<vmem>>, vector<18x8xf32>,
    %cst_84 = arith.constant 0.000000e+00 : f32
    %79 = vector.broadcast %cst_84 : f32 to vector<16x128xf32>
    %c0_85 = arith.constant 0 : index
    %c0_86 = arith.constant 0 : index
    %80 = vector.load %arg6[%c0_85, %c0_86] : memref<18x144xf32, #tpu.memory_space<vmem>>, vector<16x128xf32>
    %c0_87 = arith.constant 0 : index
    %c0_88 = arith.constant 0 : index
    %c0_89 = arith.constant 0 : index
    %81 = vector.load %arg3[%c0_87, %c0_88, %c0_89] : memref<9x128x128xf32, #tpu.memory_space<vmem>>, vector<1x128x128xf32>
    %82 = vector.shape_cast %81 : vector<1x128x128xf32> to vector<128x128xf32>
    %cst_90 = arith.constant dense<0.000000e+00> : vector<16x128xf32>
    %83 = tpu.matmul %80, %82, %cst_90 {dimension_numbers = #tpu.dot_dimension_numbers<[1], [0], [0], [1], [0, 0, 1, 1], [], []>} : vector<16x128xf32>, vector<128x128xf32>, vector<16x128xf32> -> vector<16x128xf32>
    %84 = arith.addf %79, %83 : vector<16x128xf32>
    %c0_91 = arith.constant 0 : index
    %c8_92 = arith.constant 8 : index
    %85 = vector.load %arg6[%c0_91, %c8_92] : memref<18x144xf32, #tpu.memory_space<vmem>>, vector<16x128xf32>
    %c1_93 = arith.constant 1 : index
    %c0_94 = arith.constant 0 : index
    %c0_95 = arith.constant 0 : index
    %86 = vector.load %arg3[%c1_93, %c0_94, %c0_95] : memref<9x128x128xf32, #tpu.memory_space<vmem>>, vector<1x128x128xf32>
    %87 = vector.shape_cast %86 : vector<1x128x128xf32> to vector<128x128xf32>
    %cst_96 = arith.constant dense<0.000000e+00> : vector<16x128xf32>
    %88 = tpu.matmul %85, %87, %cst_96 {dimension_numbers = #tpu.dot_dimension_numbers<[1], [0], [0], [1], [0, 0, 1, 1], [], []>} : vector<16x128xf32>, vector<128x128xf32>, vector<16x128xf32> -> vector<16x128xf32>
    %89 = arith.addf %84, %88 : vector<16x128xf32>
    %c0_97 = arith.constant 0 : index
    %c16_98 = arith.constant 16 : index
    %90 = vector.load %arg6[%c0_97, %c16_98] : memref<18x144xf32, #tpu.memory_space<vmem>>, vector<16x128xf32>
    %c2_99 = arith.constant 2 : index
    %c0_100 = arith.constant 0 : index
    %c0_101 = arith.constant 0 : index
    %91 = vector.load %arg3[%c2_99, %c0_100, %c0_101] : memref<9x128x128xf32, #tpu.memory_space<vmem>>, vector<1x128x128xf32>
    %92 = vector.shape_cast %91 : vector<1x128x128xf32> to vector<128x128xf32>
    %cst_102 = arith.constant dense<0.000000e+00> : vector<16x128xf32>
    %93 = tpu.matmul %90, %92, %cst_102 {dimension_numbers = #tpu.dot_dimension_numbers<[1], [0], [0], [1], [0, 0, 1, 1], [], []>} : vector<16x128xf32>, vector<128x128xf32>, vector<16x128xf32> -> vector<16x128xf32>
    %94 = arith.addf %89, %93 : vector<16x128xf32>
    %c1_103 = arith.constant 1 : index
    %c0_104 = arith.constant 0 : index
    %95 = vector.load %arg6[%c1_103, %c0_104] : memref<18x144xf32, #tpu.memory_space<vmem>>, vector<16x128xf32>
    %c3_105 = arith.constant 3 : index
    %c0_106 = arith.constant 0 : index
    %c0_107 = arith.constant 0 : index
    %96 = vector.load %arg3[%c3_105, %c0_106, %c0_107] : memref<9x128x128xf32, #tpu.memory_space<vmem>>, vector<1x128x128xf32>
    %97 = vector.shape_cast %96 : vector<1x128x128xf32> to vector<128x128xf32>
    %cst_108 = arith.constant dense<0.000000e+00> : vector<16x128xf32>
    %98 = tpu.matmul %95, %97, %cst_108 {dimension_numbers = #tpu.dot_dimension_numbers<[1], [0], [0], [1], [0, 0, 1, 1], [], []>} : vector<16x128xf32>, vector<128x128xf32>, vector<16x128xf32> -> vector<16x128xf32>
    %99 = arith.addf %94, %98 : vector<16x128xf32>
    %c1_109 = arith.constant 1 : index
    %c8_110 = arith.constant 8 : index
    %100 = vector.load %arg6[%c1_109, %c8_110] : memref<18x144xf32, #tpu.memory_space<vmem>>, vector<16x128xf32>
    %c4_111 = arith.constant 4 : index
    %c0_112 = arith.constant 0 : index
    %c0_113 = arith.constant 0 : index
    %101 = vector.load %arg3[%c4_111, %c0_112, %c0_113] : memref<9x128x128xf32, #tpu.memory_space<vmem>>, vector<1x128x128xf32>
    %102 = vector.shape_cast %101 : vector<1x128x128xf32> to vector<128x128xf32>
    %cst_114 = arith.constant dense<0.000000e+00> : vector<16x128xf32>
    %103 = tpu.matmul %100, %102, %cst_114 {dimension_numbers = #tpu.dot_dimension_numbers<[1], [0], [0], [1], [0, 0, 1, 1], [], []>} : vector<16x128xf32>, vector<128x128xf32>, vector<16x128xf32> -> vector<16x128xf32>
    %104 = arith.addf %99, %103 : vector<16x128xf32>
    %c1_115 = arith.constant 1 : index
    %c16_116 = arith.constant 16 : index
    %105 = vector.load %arg6[%c1_115, %c16_116] : memref<18x144xf32, #tpu.memory_space<vmem>>, vector<16x128xf32>
    %c5_117 = arith.constant 5 : index
    %c0_118 = arith.constant 0 : index
    %c0_119 = arith.constant 0 : index
    %106 = vector.load %arg3[%c5_117, %c0_118, %c0_119] : memref<9x128x128xf32, #tpu.memory_space<vmem>>, vector<1x128x128xf32>
    %107 = vector.shape_cast %106 : vector<1x128x128xf32> to vector<128x128xf32>
    %cst_120 = arith.constant dense<0.000000e+00> : vector<16x128xf32>
    %108 = tpu.matmul %105, %107, %cst_120 {dimension_numbers = #tpu.dot_dimension_numbers<[1], [0], [0], [1], [0, 0, 1, 1], [], []>} : vector<16x128xf32>, vector<128x128xf32>, vector<16x128xf32> -> vector<16x128xf32>
    %109 = arith.addf %104, %108 : vector<16x128xf32>
    %c2_121 = arith.constant 2 : index
    %c0_122 = arith.constant 0 : index
    %110 = vector.load %arg6[%c2_121, %c0_122] : memref<18x144xf32, #tpu.memory_space<vmem>>, vector<16x128xf32>
    %c6_123 = arith.constant 6 : index
    %c0_124 = arith.constant 0 : index
    %c0_125 = arith.constant 0 : index
    %111 = vector.load %arg3[%c6_123, %c0_124, %c0_125] : memref<9x128x128xf32, #tpu.memory_space<vmem>>, vector<1x128x128xf32>
    %112 = vector.shape_cast %111 : vector<1x128x128xf32> to vector<128x128xf32>
    %cst_126 = arith.constant dense<0.000000e+00> : vector<16x128xf32>
    %113 = tpu.matmul %110, %112, %cst_126 {dimension_numbers = #tpu.dot_dimension_numbers<[1], [0], [0], [1], [0, 0, 1, 1], [], []>} : vector<16x128xf32>, vector<128x128xf32>, vector<16x128xf32> -> vector<16x128xf32>
    %114 = arith.addf %109, %113 : vector<16x128xf32>
    %c2_127 = arith.constant 2 : index
    %c8_128 = arith.constant 8 : index
    %115 = vector.load %arg6[%c2_127, %c8_128] : memref<18x144xf32, #tpu.memory_space<vmem>>, vector<16x128xf32>
    %c7_129 = arith.constant 7 : index
    %c0_130 = arith.constant 0 : index
    %c0_131 = arith.constant 0 : index
    %116 = vector.load %arg3[%c7_129, %c0_130, %c0_131] : memref<9x128x128xf32, #tpu.memory_space<vmem>>, vector<1x128x128xf32>
    %117 = vector.shape_cast %116 : vector<1x128x128xf32> to vector<128x128xf32>
    %cst_132 = arith.constant dense<0.000000e+00> : vector<16x128xf32>
    %118 = tpu.matmul %115, %117, %cst_132 {dimension_numbers = #tpu.dot_dimension_numbers<[1], [0], [0], [1], [0, 0, 1, 1], [], []>} : vector<16x128xf32>, vector<128x128xf32>, vector<16x128xf32> -> vector<16x128xf32>
    %119 = arith.addf %114, %118 : vector<16x128xf32>
    %c2_133 = arith.constant 2 : index
    %c16_134 = arith.constant 16 : index
    %120 = vector.load %arg6[%c2_133, %c16_134] : memref<18x144xf32, #tpu.memory_space<vmem>>, vector<16x128xf32>
    %c8_135 = arith.constant 8 : index
    %c0_136 = arith.constant 0 : index
    %c0_137 = arith.constant 0 : index
    %121 = vector.load %arg3[%c8_135, %c0_136, %c0_137] : memref<9x128x128xf32, #tpu.memory_space<vmem>>, vector<1x128x128xf32>
    %122 = vector.shape_cast %121 : vector<1x128x128xf32> to vector<128x128xf32>
    %cst_138 = arith.constant dense<0.000000e+00> : vector<16x128xf32>
    %123 = tpu.matmul %120, %122, %cst_138 {dimension_numbers = #tpu.dot_dimension_numbers<[1], [0], [0], [1], [0, 0, 1, 1], [], []>} : vector<16x128xf32>, vector<128x128xf32>, vector<16x128xf32> -> vector<16x128xf32>
    %124 = arith.addf %119, %123 : vector<16x128xf32>
    %c0_139 = arith.constant 0 : index
    %c1_140 = arith.constant 1 : index
    %c8_141 = arith.constant 8 : index
    %125 = vector.load %arg1[%c0_139, %c1_140, %c8_141] : memref<1x18x144xf32, #tpu.memory_space<vmem>>, vector<1x16x128xf32>
    %126 = vector.shape_cast %125 : vector<1x16x128xf32> to vector<16x128xf32>
    %127 = arith.addf %126, %124 : vector<16x128xf32>
    %128 = vector.extract_strided_slice %0 {offsets = [1, 0], sizes = [1, 128], strides = [1, 1]} : vector<2x128xf32> to vector<1x128xf32>
    %129 = vector.broadcast %128 : vector<1x128xf32> to vector<16x128xf32>
    %130 = arith.addf %127, %129 : vector<16x128xf32>
    %cst_142 = arith.constant 0.000000e+00 : f32
    %131 = vector.broadcast %cst_142 : f32 to vector<16x128xf32>
    %132 = arith.maximumf %130, %131 : vector<16x128xf32>
    %c0_143 = arith.constant 0 : index
    %c0_144 = arith.constant 0 : index
    %c0_145 = arith.constant 0 : index
    %133 = vector.load %arg5[%c0_143, %c0_144, %c0_145] : memref<1x16x128xf32, #tpu.memory_space<vmem>>, vector<1x16x128xf32>
    %134 = vector.shape_cast %133 : vector<1x16x128xf32> to vector<16x128xf32>
    %135 = vector.shape_cast %132 : vector<16x128xf32> to vector<1x16x128xf32>
    tpu.vector_store %arg5[%c0_143, %c0_144, %c0_145], %135 {strides = array<i32>} : memref<1x16x128xf32, #tpu.memory_space<vmem>>, vector<1x16x128xf32>,
    return
  }
  func.func @transform_0(%arg0: i32) -> (i32, i32, i32) {
    %c0_i32 = arith.constant 0 : i32
    %c0_i32_0 = arith.constant 0 : i32
    %c0_i32_1 = arith.constant 0 : i32
    return %arg0, %c0_i32, %c0_i32_0 : i32, i32, i32
  }
  func.func @transform_1(%arg0: i32) -> (i32, i32, i32) {
    %c0_i32 = arith.constant 0 : i32
    %c0_i32_0 = arith.constant 0 : i32
    %c0_i32_1 = arith.constant 0 : i32
    %c0_i32_2 = arith.constant 0 : i32
    return %c0_i32, %c0_i32_0, %c0_i32_1 : i32, i32, i32
  }
  func.func @transform_2(%arg0: i32) -> (i32, i32, i32) {
    %c0_i32 = arith.constant 0 : i32
    %c0_i32_0 = arith.constant 0 : i32
    %c0_i32_1 = arith.constant 0 : i32
    %c0_i32_2 = arith.constant 0 : i32
    return %c0_i32, %c0_i32_0, %c0_i32_1 : i32, i32, i32
  }
  func.func @transform_3(%arg0: i32) -> (i32, i32) {
    %c0_i32 = arith.constant 0 : i32
    %c0_i32_0 = arith.constant 0 : i32
    %c0_i32_1 = arith.constant 0 : i32
    return %c0_i32, %c0_i32_0 : i32, i32
  }
  func.func @transform_4(%arg0: i32) -> (i32, i32, i32) {
    %c0_i32 = arith.constant 0 : i32
    %c0_i32_0 = arith.constant 0 : i32
    %c0_i32_1 = arith.constant 0 : i32
    return %arg0, %c0_i32, %c0_i32_0 : i32, i32, i32
  }
}

</mosaic_0001>

<bundles_post_ra>
// kernel: tile.13
= control target key start
LH: loop header
LB: loop body
LE: loop exit
PB: predicated region body
PF: predicated region fallthrough
CT: control target
= control target key end

     0   :  { %s28_s0 = inlined_call_operand.vmem [shape: f32[8], index: 0, kind: input, shape index: {}]   ;;  %s29_s1 = inlined_call_operand.vmem [shape: f32[16,8], index: 1, kind: output, shape index: {}]  }
   0x1   :  { %v4_v0 = vld [vmem:[%s28_s0] ss:$0 sm:$0xff] }
   0x2   :  { %5 = vst [vmem:[%s29_s1] sm:$0xff] %v4_v0 }
   0x3   :  { %8 = vst [vmem:[%s29_s1 + $0x8] sm:$0xff] %v4_v0 }

// kernel: tile.18
= control target key start
LH: loop header
LB: loop body
LE: loop exit
PB: predicated region body
PF: predicated region fallthrough
CT: control target
= control target key end

     0   :  { %s131_s10 = smov 120   ;;  %s132_s11 = smov 104   ;;  %vm3_vm0 = vcmask 64512   ;;  %vm9_vm1 = vcmask 1048512   ;;  %vm15_vm2 = vcmask 982912   ;;  %vm21_vm3 = vcmask 917312   ;;  %s207_s0 = inlined_call_operand.vmem [shape: f32[16,8], index: 0, kind: input, shape index: {}]   ;;  %s208_s1 = inlined_call_operand.vmem [shape: f32[1,128], index: 1, kind: output, shape index: {}]  }
   0x1   :  { %v101_v0 = vld [vmem:[%s207_s0 + $0xf] sm:$0x1]   ;;  %v103_v1 = vld [vmem:[%s207_s0 + $0xd] sm:$0x1]   ;;  %v105_v2 = vld [vmem:[%s207_s0 + $0xb] sm:$0x1]  }
   0x2   :  { %7 = vrot.lane.b32.xlu0 %v101_v0, %s131_s10  ;;  %19 = vrot.lane.b32.xlu1 %v103_v1, %s132_s11  ;;  %s133_s14 = smov 88   ;;  %v102_v3 = vld [vmem:[%s207_s0 + $0xe] sm:$0x1]   ;;  %v104_v4 = vld [vmem:[%s207_s0 + $0xc] sm:$0x1]   ;;  %s134_s19 = smov 112  }
   0x3   :  { %31 = vrot.lane.b32.xlu2 %v105_v2, %s133_s14  ;;  %s135_s20 = smov 96   ;;  %v106_v5 = vld [vmem:[%s207_s0 + $0xa] sm:$0x1]   ;;  %s136_s23 = smov 80   ;;  %v107_v6 = vld [vmem:[%s207_s0 + $0x9] sm:$0x1]  }
   0x4   :  { %v108_v7 = vld [vmem:[%s207_s0 + $0x8] sm:$0x1]   ;;  %s137_s28 = smov 72   ;;  %s138_s29 = smov 64   ;;  %v109_v8 = vld [vmem:[%s207_s0 + $0x7] sm:$0x1]  }
   0x5   :  { %s139_s3 = smov 56   ;;  %v110_v9 = vld [vmem:[%s207_s0 + $0x6] sm:$0x1]   ;;  %v111_v10 = vld [vmem:[%s207_s0 + $0x5] sm:$0x1]   ;;  %s140_s8 = smov 48  }
   0x6   :  { %s141_s9 = smov 40   ;;  %v112_v11 = vld [vmem:[%s207_s0 + $0x4] sm:$0x1]   ;;  %s142_s12 = smov 32   ;;  %v113_v12 = vld [vmem:[%s207_s0 + $0x3] sm:$0x1]  }
   0x7   :  { %v114_v13 = vld [vmem:[%s207_s0 + $0x2] sm:$0x1]   ;;  %s143_s17 = smov 24   ;;  %s144_s18 = smov 16   ;;  %v115_v14 = vld [vmem:[%s207_s0 + $0x1] sm:$0x1]  }
   0x8   :  { %s145_s21 = smov 8   ;;  %v2_v15 = vld [vmem:[%s207_s0] sm:$0x1]   ;;  %vm27_vm4 = vcmask 851712   ;;  %vm33_vm5 = vcmask 786112   ;;  %vm39_vm6 = vcmask 720512  }
   0x9   :  { %4 = vst.msk [vmem:[#allocation0] sm:$0x1] %vm3_vm0, %v2_v15   ;;  %vm45_vm7 = vcmask 654912   ;;  %vm51_vm8 = vcmask 589312   ;;  %vm57_vm9 = vcmask 523712   ;;  %vm63_vm10 = vcmask 458112  }
   0xa   :  { %13 = vrot.lane.b32.xlu0 %v102_v3, %s134_s19  ;;  %25 = vrot.lane.b32.xlu1 %v104_v4, %s135_s20  ;;  %vm69_vm11 = vcmask 392512   ;;  %vm75_vm12 = vcmask 326912   ;;  %vm81_vm13 = vcmask 261312   ;;  %vm87_vm14 = vcmask 195712  }
   0xb   :  { %37 = vrot.lane.b32.xlu2 %v106_v5, %s136_s23  ;;  %vm93_vm15 = vcmask 130112  }
  0x12   :  { %43 = vrot.lane.b32.xlu0 %v107_v6, %s137_s28  ;;  %49 = vrot.lane.b32.xlu1 %v108_v7, %s138_s29 }
  0x13   :  { %55 = vrot.lane.b32.xlu2 %v109_v8, %s139_s3 }
  0x1a   :  { %61 = vrot.lane.b32.xlu0 %v110_v9, %s140_s8  ;;  %67 = vrot.lane.b32.xlu1 %v111_v10, %s141_s9 }
  0x1b   :  { %73 = vrot.lane.b32.xlu2 %v112_v11, %s142_s12 }
  0x22   :  { %79 = vrot.lane.b32.xlu0 %v113_v12, %s143_s17  ;;  %85 = vrot.lane.b32.xlu1 %v114_v13, %s144_s18 }
  0x23   :  { %91 = vrot.lane.b32.xlu2 %v115_v14, %s145_s21 }
  0x5d   :  { %v32_v16 = vpop.permute.xlu2 %31  }
  0x65   :  { %v38_v17 = vpop.permute.xlu2 %37  }
  0x6d   :  { %v56_v18 = vpop.permute.xlu2 %55  }
  0x74   :  { %v8_v19 = vpop.permute.xlu0 %7   ;;  %v20_v20 = vpop.permute.xlu1 %19  }
  0x75   :  { %10 = vst.msk [vmem:[#allocation0] sm:$0x1] %vm9_vm1, %v8_v19   ;;  %v74_v21 = vpop.permute.xlu2 %73  }
  0x7c   :  { %v14_v22 = vpop.permute.xlu0 %13   ;;  %v26_v23 = vpop.permute.xlu1 %25  }
  0x7d   :  { %16 = vst.msk [vmem:[#allocation0] sm:$0x1] %vm15_vm2, %v14_v22   ;;  %v92_v24 = vpop.permute.xlu2 %91  }
  0x7e   :  { %22 = vst.msk [vmem:[#allocation0] sm:$0x1] %vm21_vm3, %v20_v20  }
  0x7f   :  { %28 = vst.msk [vmem:[#allocation0] sm:$0x1] %vm27_vm4, %v26_v23  }
  0x80   :  { %34 = vst.msk [vmem:[#allocation0] sm:$0x1] %vm33_vm5, %v32_v16  }
  0x81   :  { %40 = vst.msk [vmem:[#allocation0] sm:$0x1] %vm39_vm6, %v38_v17  }
  0x84   :  { %v44_v25 = vpop.permute.xlu0 %43   ;;  %v50_v26 = vpop.permute.xlu1 %49  }
  0x85   :  { %46 = vst.msk [vmem:[#allocation0] sm:$0x1] %vm45_vm7, %v44_v25  }
  0x86   :  { %52 = vst.msk [vmem:[#allocation0] sm:$0x1] %vm51_vm8, %v50_v26  }
  0x87   :  { %58 = vst.msk [vmem:[#allocation0] sm:$0x1] %vm57_vm9, %v56_v18  }
  0x8c   :  { %v62_v27 = vpop.permute.xlu0 %61   ;;  %v68_v28 = vpop.permute.xlu1 %67  }
  0x8d   :  { %64 = vst.msk [vmem:[#allocation0] sm:$0x1] %vm63_vm10, %v62_v27  }
  0x8e   :  { %70 = vst.msk [vmem:[#allocation0] sm:$0x1] %vm69_vm11, %v68_v28  }
  0x8f   :  { %76 = vst.msk [vmem:[#allocation0] sm:$0x1] %vm75_vm12, %v74_v21  }
  0x94   :  { %v80_v29 = vpop.permute.xlu0 %79   ;;  %v86_v30 = vpop.permute.xlu1 %85  }
  0x95   :  { %82 = vst.msk [vmem:[#allocation0] sm:$0x1] %vm81_vm13, %v80_v29  }
  0x96   :  { %88 = vst.msk [vmem:[#allocation0] sm:$0x1] %vm87_vm14, %v86_v30  }
  0x97   :  { %94 = vst.msk [vmem:[#allocation0] sm:$0x1] %vm93_vm15, %v92_v24  }
  0x9e   :  { %v97_v31 = vld [vmem:[#allocation0] sm:$0x1] }
  0x9f   :  { %100 = vst [vmem:[%s208_s1] sm:$0x1] %v97_v31 }

// kernel: fixup_basic_block.1
= control target key start
LH: loop header
LB: loop body
LE: loop exit
PB: predicated region body
PF: predicated region fallthrough
CT: control target
= control target key end

     0   :  { %s1915_s15 = smov 0   ;;  %s2989_s0 = inlined_call_operand.vmem [shape: f32[2,18,144], index: 0, kind: input, shape index: {}]   ;;  %s2990_s1 = inlined_call_operand.vmem [shape: f32[9,128,128], index: 1, kind: input, shape index: {}]   ;;  %s2991_s2 = inlined_call_operand.vmem [shape: f32[9,128,128], index: 2, kind: input, shape index: {}]   ;;  %s2992_s3 = inlined_call_operand.vmem [shape: f32[2,128], index: 3, kind: input, shape index: {}]   ;;  %s2993_s4 = inlined_call_operand.vmem [shape: f32[2,16,128], index: 4, kind: output, shape index: {}]  }
   0x1 LB: > { %s1445_s16 = sadd.s32 4294967295, %s1884_s15   ;;  %p1449_p0 = scmp.ge.s32.totalorder %s1884_s15, 1  ;;  %s1884_s15 = sphi %s1915_s15, %s14_s15  }
   0x2   : > { %p162_p1 = scmp.lt.s32.totalorder %s1884_s15, 3 }
   0x4   : > { %p163_p2 = pnand %p1449_p0, %p162_p1 }
   0x5   : > { %p188_p3 = scmp.lt.s32.totalorder (!%p163_p2), %s1445_s16, 1  ;;  %s1886_s5 = smov (!%p163_p2), 120  }
   0x6   : > { %166 = sbr.rel (%p163_p2) target bundleno = 1186 (0x4a2), region = 36  ;;  %s1887_s8 = smov (!%p163_p2), 112  }
   0x7   : > { %s1888_s13 = smov (!%p163_p2), 8   ;;  %s1889_s20 = smov (!%p163_p2), 16  }
   0xb   : > { %s2995_s16 = smov (!%p188_p3, %s1445_s16), 1  ;;  %v1468_v0 = vld [vmem:[%s2990_s1 + $0xf8] sm:$0xff]  ;;  %v1467_v1 = vld [vmem:[%s2990_s1 + $0xf0] sm:$0xff]  ;;  %v1466_v2 = vld [vmem:[%s2990_s1 + $0xe8] sm:$0xff]  ;;  %vm377_vm0 = vcmask 1046528   ;;  %vm561_vm1 = vcmask 1045504  }
   0xc   : > { %s1744_s21 = smul.u32 48, %s2995_s16  ;;  %253 = vmatpush.msra.mxu0 %v1468_v0  ;;  %v1465_v3 = vld [vmem:[%s2990_s1 + $0xe0] sm:$0xff]  ;;  %v1464_v16 = vld [vmem:[%s2990_s1 + $0xd8] sm:$0xff]  ;;  %v1463_v17 = vld [vmem:[%s2990_s1 + $0xd0] sm:$0xff]  ;;  %vm248_vm2 = vcmask 982016   ;;  %vm324_vm3 = vcmask 916480  }
   0xd   : > { %v216_v22 = vld [vmem:[%s2990_s1 + $0x78] sm:$0xff]  ;;  %v1462_v28 = vld [vmem:[%s2990_s1 + $0xc8] sm:$0xff]  ;;  %v215_v29 = vld [vmem:[%s2990_s1 + $0x70] sm:$0xff]  ;;  %vm727_vm4 = vcmask 1040384   ;;  %vm744_vm5 = vcmask 1047616   ;;  %vm746_vm6 = vcmask 64512  }
   0xe   : > { %s1938_s26 = scalar_lea.vmem %s2989_s0, %s1744_s21  ;;  %254 = vmatpush.msra.mxu0 %v1467_v1  ;;  %276 = vmatpush.msra.mxu1 %v216_v22  ;;  %v1461_v30 = vld [vmem:[%s2990_s1 + $0xc0] sm:$0xff]  ;;  %v214_v31 = vld [vmem:[%s2990_s1 + $0x68] sm:$0xff]  ;;  %v1484_v32 = vld [vmem:[%s2990_s1 + $0x178] sm:$0xff]  ;;  %vm748_vm7 = vcmask 1040448   ;;  %vm750_vm8 = vcmask 57344   ;;  %vm740_vm9 = vcmask 1047617  }
   0xf   : > { %v1944_v4 = vld [vmem:[%s1938_s26] sm:$0xff]  ;;  %v217_v5 = vld [vmem:[%s1938_s26 + $0x8] sm:$0xff]  ;;  %v1948_v6 = vld [vmem:[%s1938_s26 + $0x10] sm:$0xff]  ;;  %329 = vmatpush.msra.mxu2 %v1484_v32  ;;  %vm742_vm10 = vcmask 64513   ;;  %vm781_vm11 = vcmask 58368   ;;  %vm798_vm12 = vcmask 130112  }
  0x10   : > { %v1757_v7 = vpack.i.bf16 %v217_v5, %v1944_v4  ;;  %v1952_v8 = vld [vmem:[%s1938_s26 + $0x18] sm:$0xff]  ;;  %v410_v9 = vld [vmem:[%s1938_s26] sm:$0xfe]  ;;  %v411_v10 = vld [vmem:[%s1938_s26 + $0x8] sm:$0xfe]  ;;  %v1957_v11 = vrot.slane %v1948_v6, 1  ;;  %255 = vmatpush.msra.mxu0 %v1466_v2  ;;  %277 = vmatpush.msra.mxu1 %v215_v29 }
  0x11   : > { %v1772_v12 = vpack.i.bf16 %v1952_v8, %v1948_v6  ;;  %v439_v13 = vrot.slane %v410_v9, 1  ;;  %v442_v14 = vrot.slane %v411_v10, 1  ;;  %v443_v15 = vrot.slane %v1952_v8, 1  ;;  %v414_v20 = vld [vmem:[%s1938_s26 + $0x20] sm:$0x1]  ;;  %v1483_v37 = vld [vmem:[%s2990_s1 + $0x170] sm:$0xff] }
  0x12   : > { %1758 = vrot.lane.b32.xlu0 %v1757_v7, %s1886_s5  ;;  %256 = vmatpush.msra.mxu0 %v1465_v3  ;;  %v415_v21 = vld [vmem:[%s1938_s26 + $0x28] sm:$0x1]  ;;  %v594_v24 = vld [vmem:[%s1938_s26] sm:$0xfc]  ;;  %v595_v25 = vld [vmem:[%s1938_s26 + $0x8] sm:$0xfc] }
  0x13   : > { %1768 = vrot.lane.b32.xlu1 %v1772_v12, %s1886_s5  ;;  %v441_v18 = vsel %vm377_vm0, %v439_v13, %v1957_v11  ;;  %v444_v19 = vsel %vm377_vm0, %v442_v14, %v443_v15  ;;  %v445_v26 = vrot.slane %v414_v20, 1  ;;  %v447_v27 = vrot.slane %v415_v21, 1  ;;  %v1500_v38 = vld [vmem:[%s2990_s1 + $0x1f8] sm:$0xff]  ;;  %v596_v39 = vld [vmem:[%s1938_s26 + $0x20] sm:$0x3]  ;;  %278 = vmatpush.msra.mxu1 %v214_v31  ;;  %v1482_v45 = vld [vmem:[%s2990_s1 + $0x168] sm:$0xff] }
  0x14   : > { %v1978_v23 = vpack.i.bf16 %v444_v19, %v441_v18  ;;  %257 = vmatpush.msra.mxu0 %v1464_v16  ;;  %v619_v33 = vrot.slane %v594_v24, 2  ;;  %v2000_v34 = vrot.slane %v1948_v6, 2  ;;  %v622_v35 = vrot.slane %v595_v25, 2  ;;  %v597_v40 = vld [vmem:[%s1938_s26 + $0x28] sm:$0x3]  ;;  %v213_v41 = vld [vmem:[%s2990_s1 + $0x60] sm:$0xff]  ;;  %385 = vmatpush.msra.mxu3 %v1500_v38 }
  0x15   : > { %v623_v36 = vrot.slane %v1952_v8, 2  ;;  %v446_v42 = vsel %vm377_vm0, %v1957_v11, %v445_v26  ;;  %v448_v43 = vsel %vm377_vm0, %v443_v15, %v447_v27  ;;  %v1460_v44 = vld [vmem:[%s2990_s1 + $0xb8] sm:$0xff]  ;;  %330 = vmatpush.msra.mxu2 %v1483_v37  ;;  %v1499_v47 = vld [vmem:[%s2990_s1 + $0x1f0] sm:$0xff]  ;;  %v625_v50 = vrot.slane %v596_v39, 2  ;;  %279 = vmatpush.msra.mxu1 %v213_v41  ;;  %v1481_v55 = vld [vmem:[%s2990_s1 + $0x160] sm:$0xff] }
  0x16   : > { %1778 = vrot.lane.b32.xlu2 %v1978_v23, %s1886_s5  ;;  %258 = vmatpush.msra.mxu0 %v1463_v17  ;;  %v212_v46 = vld [vmem:[%s2990_s1 + $0x58] sm:$0xff]  ;;  %v621_v48 = vsel %vm561_vm1, %v619_v33, %v2000_v34  ;;  %v627_v51 = vrot.slane %v597_v40, 2  ;;  %v1459_v52 = vld [vmem:[%s2990_s1 + $0xb0] sm:$0xff]  ;;  %v1807_v53 = vpack.i.bf16 %v448_v43, %v446_v42  ;;  %v1458_v56 = vld [vmem:[%s2990_s1 + $0xa8] sm:$0xff]  ;;  %vm801_vm13 = vcmask 123968  }
  0x17   : > { %v624_v49 = vsel %vm561_vm1, %v622_v35, %v623_v36  ;;  %331 = vmatpush.msra.mxu2 %v1482_v45  ;;  %v211_v54 = vld [vmem:[%s2990_s1 + $0x50] sm:$0xff]  ;;  %280 = vmatpush.msra.mxu1 %v212_v46  ;;  %v1498_v57 = vld [vmem:[%s2990_s1 + $0x1e8] sm:$0xff]  ;;  %v1480_v60 = vld [vmem:[%s2990_s1 + $0x158] sm:$0xff]  ;;  %v626_v61 = vsel %vm561_vm1, %v2000_v34, %v625_v50 }
  0x18   : > { %259 = vmatpush.msra.mxu0 %v1462_v28  ;;  %386 = vmatpush.msra.mxu3 %v1499_v47  ;;  %v1787_v58 = vpack.i.bf16 %v624_v49, %v621_v48  ;;  %v210_v59 = vld [vmem:[%s2990_s1 + $0x48] sm:$0xff]  ;;  %v628_v62 = vsel %vm561_vm1, %v623_v36, %v627_v51  ;;  %v1457_v63 = vld [vmem:[%s2990_s1 + $0xa0] sm:$0xff]  ;;  %v1456_v1 = vld [vmem:[%s2990_s1 + $0x98] sm:$0xff] }
  0x19   : > { %281 = vmatpush.msra.mxu1 %v211_v54  ;;  %332 = vmatpush.msra.mxu2 %v1481_v55  ;;  %v1497_v0 = vld [vmem:[%s2990_s1 + $0x1e0] sm:$0xff]  ;;  %v1797_v3 = vpack.i.bf16 %v628_v62, %v626_v61  ;;  %v1479_v5 = vld [vmem:[%s2990_s1 + $0x150] sm:$0xff]  ;;  %v208_v9 = vld [vmem:[%s2990_s1 + $0x38] sm:$0xff] }
  0x1a   : > { %1763 = vrot.lane.b32.xlu0 %v1757_v7, %s1887_s8  ;;  %260 = vmatpush.msra.mxu0 %v1461_v30  ;;  %v209_v2 = vld [vmem:[%s2990_s1 + $0x40] sm:$0xff]  ;;  %v1496_v7 = vld [vmem:[%s2990_s1 + $0x1d8] sm:$0xff]  ;;  %v1455_v8 = vld [vmem:[%s2990_s1 + $0x90] sm:$0xff] }
  0x1b   : > { %1773 = vrot.lane.b32.xlu1 %v1772_v12, %s1887_s8  ;;  %387 = vmatpush.msra.mxu3 %v1498_v57  ;;  %v1478_v10 = vld [vmem:[%s2990_s1 + $0x148] sm:$0xff]  ;;  %v1495_v13 = vld [vmem:[%s2990_s1 + $0x1d0] sm:$0xff]  ;;  %v1477_v15 = vld [vmem:[%s2990_s1 + $0x140] sm:$0xff] }
  0x1c   : > { %261 = vmatpush.msra.mxu0 %v1460_v44  ;;  %282 = vmatpush.msra.mxu1 %v210_v59  ;;  %v1454_v12 = vld [vmem:[%s2990_s1 + $0x88] sm:$0xff]  ;;  %v207_v14 = vld [vmem:[%s2990_s1 + $0x30] sm:$0xff]  ;;  %v1453_v16 = vld [vmem:[%s2990_s1 + $0x80] sm:$0xff] }
  0x1d   : > { %333 = vmatpush.msra.mxu2 %v1480_v60  ;;  %388 = vmatpush.msra.mxu3 %v1497_v0  ;;  %v1516_v17 = vld [vmem:[%s2990_s1 + $0x278] sm:$0xff]  ;;  %v1494_v18 = vld [vmem:[%s2990_s1 + $0x1c8] sm:$0xff]  ;;  %v1515_v20 = vld [vmem:[%s2990_s1 + $0x270] sm:$0xff] }
  0x1e   : > { %1783 = vrot.lane.b32.xlu2 %v1807_v53, %s1886_s5  ;;  %262 = vmatpush.msra.mxu0 %v1459_v52  ;;  %v206_v19 = vld [vmem:[%s2990_s1 + $0x28] sm:$0xff]  ;;  %v1476_v21 = vld [vmem:[%s2990_s1 + $0x138] sm:$0xff]  ;;  %v1493_v22 = vld [vmem:[%s2990_s1 + $0x1c0] sm:$0xff] }
  0x1f   : > { %283 = vmatpush.msra.mxu1 %v209_v2  ;;  %334 = vmatpush.msra.mxu2 %v1479_v5  ;;  %v205_v24 = vld [vmem:[%s2990_s1 + $0x20] sm:$0xff]  ;;  %v1475_v25 = vld [vmem:[%s2990_s1 + $0x130] sm:$0xff]  ;;  %v1492_v26 = vld [vmem:[%s2990_s1 + $0x1b8] sm:$0xff] }
  0x20   : > { %263 = vmatpush.msra.mxu0 %v1458_v56  ;;  %389 = vmatpush.msra.mxu3 %v1496_v7  ;;  %v1513_v27 = vld [vmem:[%s2990_s1 + $0x260] sm:$0xff]  ;;  %v204_v28 = vld [vmem:[%s2990_s1 + $0x18] sm:$0xff]  ;;  %v1474_v29 = vld [vmem:[%s2990_s1 + $0x128] sm:$0xff] }
  0x21   : > { %284 = vmatpush.msra.mxu1 %v208_v9  ;;  %335 = vmatpush.msra.mxu2 %v1478_v10  ;;  %v1491_v30 = vld [vmem:[%s2990_s1 + $0x1b0] sm:$0xff]  ;;  %v1512_v31 = vld [vmem:[%s2990_s1 + $0x258] sm:$0xff]  ;;  %v1473_v33 = vld [vmem:[%s2990_s1 + $0x120] sm:$0xff] }
  0x22   : > { %1788 = vrot.lane.b32.xlu0 %v1787_v58, %s1886_s5  ;;  %264 = vmatpush.msra.mxu0 %v1457_v63  ;;  %v203_v32 = vld [vmem:[%s2990_s1 + $0x10] sm:$0xff]  ;;  %v1490_v35 = vld [vmem:[%s2990_s1 + $0x1a8] sm:$0xff]  ;;  %v1472_v38 = vld [vmem:[%s2990_s1 + $0x118] sm:$0xff] }
  0x23   : > { %1793 = vrot.lane.b32.xlu1 %v1978_v23, %s1887_s8  ;;  %390 = vmatpush.msra.mxu3 %v1495_v13  ;;  %v1514_v23 = vld [vmem:[%s2990_s1 + $0x268] sm:$0xff]  ;;  %v1511_v36 = vld [vmem:[%s2990_s1 + $0x250] sm:$0xff]  ;;  %v1489_v39 = vld [vmem:[%s2990_s1 + $0x1a0] sm:$0xff] }
  0x24   : > { %265 = vmatpush.msra.mxu0 %v1456_v1  ;;  %285 = vmatpush.msra.mxu1 %v207_v14  ;;  %v202_v37 = vld [vmem:[%s2990_s1 + $0x8] sm:$0xff]  ;;  %v201_v41 = vld [vmem:[%s2990_s1] sm:$0xff]  ;;  %v1471_v42 = vld [vmem:[%s2990_s1 + $0x110] sm:$0xff] }
  0x25   : > { %336 = vmatpush.msra.mxu2 %v1477_v15  ;;  %391 = vmatpush.msra.mxu3 %v1494_v18  ;;  %v1510_v40 = vld [vmem:[%s2990_s1 + $0x248] sm:$0xff]  ;;  %v1488_v43 = vld [vmem:[%s2990_s1 + $0x198] sm:$0xff]  ;;  %v1509_v44 = vld [vmem:[%s2990_s1 + $0x240] sm:$0xff] }
  0x26   : > { %1798 = vrot.lane.b32.xlu2 %v1797_v3, %s1886_s5  ;;  %266 = vmatpush.msra.mxu0 %v1455_v8  ;;  %v1532_v45 = vld [vmem:[%s2990_s1 + $0x2f8] sm:$0xff]  ;;  %v1470_v46 = vld [vmem:[%s2990_s1 + $0x108] sm:$0xff]  ;;  %v1487_v47 = vld [vmem:[%s2990_s1 + $0x190] sm:$0xff] }
  0x27   : > { %286 = vmatpush.msra.mxu1 %v206_v19  ;;  %337 = vmatpush.msra.mxu2 %v1476_v21  ;;  %v1508_v48 = vld [vmem:[%s2990_s1 + $0x238] sm:$0xff]  ;;  %v1531_v49 = vld [vmem:[%s2990_s1 + $0x2f0] sm:$0xff]  ;;  %v1469_v50 = vld [vmem:[%s2990_s1 + $0x100] sm:$0xff] }
  0x28   : > { %267 = vmatpush.msra.mxu0 %v1454_v12  ;;  %392 = vmatpush.msra.mxu3 %v1493_v22  ;;  %v1486_v51 = vld [vmem:[%s2990_s1 + $0x188] sm:$0xff]  ;;  %v1507_v52 = vld [vmem:[%s2990_s1 + $0x230] sm:$0xff]  ;;  %v1548_v54 = vld [vmem:[%s2990_s1 + $0x378] sm:$0xff] }
  0x29   : > { %287 = vmatpush.msra.mxu1 %v205_v24  ;;  %338 = vmatpush.msra.mxu2 %v1475_v25  ;;  %v1485_v55 = vld [vmem:[%s2990_s1 + $0x180] sm:$0xff]  ;;  %v1506_v56 = vld [vmem:[%s2990_s1 + $0x228] sm:$0xff]  ;;  %v1564_v59 = vld [vmem:[%s2990_s1 + $0x3f8] sm:$0xff] }
  0x2a   : > { %1803 = vrot.lane.b32.xlu0 %v1787_v58, %s1887_s8  ;;  %268 = vmatpush.msra.mxu0 %v1453_v16  ;;  %v1529_v57 = vld [vmem:[%s2990_s1 + $0x2e0] sm:$0xff]  ;;  %v1547_v58 = vld [vmem:[%s2990_s1 + $0x370] sm:$0xff]  ;;  %v1504_v61 = vld [vmem:[%s2990_s1 + $0x218] sm:$0xff] }
  0x2b   : > { %1808 = vrot.lane.b32.xlu1 %v1807_v53, %s1887_s8  ;;  %393 = vmatpush.msra.mxu3 %v1492_v26  ;;  %v1530_v53 = vld [vmem:[%s2990_s1 + $0x2e8] sm:$0xff]  ;;  %v1505_v60 = vld [vmem:[%s2990_s1 + $0x220] sm:$0xff]  ;;  %v1528_v62 = vld [vmem:[%s2990_s1 + $0x2d8] sm:$0xff] }
  0x2c   : > { %461 = vmatpush.msrb.mxu0 %v1516_v17  ;;  %288 = vmatpush.msra.mxu1 %v204_v28  ;;  %v1546_v63 = vld [vmem:[%s2990_s1 + $0x368] sm:$0xff]  ;;  %v1563_v0 = vld [vmem:[%s2990_s1 + $0x3f0] sm:$0xff]  ;;  %v1545_v1 = vld [vmem:[%s2990_s1 + $0x360] sm:$0xff] }
  0x2d   : > { %339 = vmatpush.msra.mxu2 %v1474_v29  ;;  %394 = vmatpush.msra.mxu3 %v1491_v30  ;;  %v1562_v2 = vld [vmem:[%s2990_s1 + $0x3e8] sm:$0xff]  ;;  %v1544_v7 = vld [vmem:[%s2990_s1 + $0x358] sm:$0xff]  ;;  %v1561_v8 = vld [vmem:[%s2990_s1 + $0x3e0] sm:$0xff] }
  0x2e   : > { %462 = vmatpush.msrb.mxu0 %v1515_v20  ;;  %1813 = vrot.lane.b32.xlu2 %v1797_v3, %s1887_s8  ;;  %v1502_v3 = vld [vmem:[%s2990_s1 + $0x208] sm:$0xff]  ;;  %v1501_v9 = vld [vmem:[%s2990_s1 + $0x200] sm:$0xff]  ;;  %v1543_v12 = vld [vmem:[%s2990_s1 + $0x350] sm:$0xff] }
  0x2f   : > { %289 = vmatpush.msra.mxu1 %v203_v32  ;;  %340 = vmatpush.msra.mxu2 %v1473_v33  ;;  %v1526_v5 = vld [vmem:[%s2990_s1 + $0x2c8] sm:$0xff]  ;;  %v1525_v10 = vld [vmem:[%s2990_s1 + $0x2c0] sm:$0xff]  ;;  %v1560_v13 = vld [vmem:[%s2990_s1 + $0x3d8] sm:$0xff] }
  0x30   : > { %463 = vmatpush.msrb.mxu0 %v1514_v23  ;;  %395 = vmatpush.msra.mxu3 %v1490_v35  ;;  %v1524_v14 = vld [vmem:[%s2990_s1 + $0x2b8] sm:$0xff]  ;;  %v1542_v15 = vld [vmem:[%s2990_s1 + $0x348] sm:$0xff]  ;;  %v1559_v16 = vld [vmem:[%s2990_s1 + $0x3d0] sm:$0xff] }
  0x31   : > { %290 = vmatpush.msra.mxu1 %v202_v37  ;;  %341 = vmatpush.msra.mxu2 %v1472_v38  ;;  %v1523_v17 = vld [vmem:[%s2990_s1 + $0x2b0] sm:$0xff]  ;;  %v1541_v18 = vld [vmem:[%s2990_s1 + $0x340] sm:$0xff]  ;;  %v1558_v19 = vld [vmem:[%s2990_s1 + $0x3c8] sm:$0xff] }
  0x32   : > { %464 = vmatpush.msrb.mxu0 %v1513_v27  ;;  %396 = vmatpush.msra.mxu3 %v1489_v39  ;;  %v354_v20 = vld [vmem:[%s1938_s26] sm:$0xfe]  ;;  %v1522_v22 = vld [vmem:[%s2990_s1 + $0x2a8] sm:$0xff]  ;;  %v1540_v23 = vld [vmem:[%s2990_s1 + $0x338] sm:$0xff] }
  0x33   : > { %291 = vmatpush.msra.mxu1 %v201_v41  ;;  %342 = vmatpush.msra.mxu2 %v1471_v42  ;;  %v378_v21 = vrot.slane %v354_v20, 1  ;;  %v1557_v24 = vld [vmem:[%s2990_s1 + $0x3c0] sm:$0xff]  ;;  %v1539_v27 = vld [vmem:[%s2990_s1 + $0x330] sm:$0xff]  ;;  %v1556_v28 = vld [vmem:[%s2990_s1 + $0x3b8] sm:$0xff] }
  0x34   : > { %465 = vmatpush.msrb.mxu0 %v1512_v31  ;;  %397 = vmatpush.msra.mxu3 %v1488_v43  ;;  %v1521_v26 = vld [vmem:[%s2990_s1 + $0x2a0] sm:$0xff]  ;;  %v1520_v29 = vld [vmem:[%s2990_s1 + $0x298] sm:$0xff]  ;;  %v1538_v30 = vld [vmem:[%s2990_s1 + $0x328] sm:$0xff] }
  0x35   : > { %515 = vmatpush.msrb.mxu1 %v1532_v45  ;;  %343 = vmatpush.msra.mxu2 %v1470_v46  ;;  %v380_v25 = vsel %vm377_vm0, %v378_v21, %v1957_v11  ;;  %v1555_v31 = vld [vmem:[%s2990_s1 + $0x3b0] sm:$0xff]  ;;  %v1537_v33 = vld [vmem:[%s2990_s1 + $0x320] sm:$0xff]  ;;  %v1554_v35 = vld [vmem:[%s2990_s1 + $0x3a8] sm:$0xff] }
  0x36   : > { %466 = vmatpush.msrb.mxu0 %v1511_v36  ;;  %398 = vmatpush.msra.mxu3 %v1487_v47  ;;  %v1519_v32 = vld [vmem:[%s2990_s1 + $0x290] sm:$0xff]  ;;  %v356_v36 = vld [vmem:[%s1938_s26 + $0x20] sm:$0x1]  ;;  %v1518_v38 = vld [vmem:[%s2990_s1 + $0x288] sm:$0xff] }
  0x37   : > { %516 = vmatpush.msrb.mxu1 %v1531_v49  ;;  %344 = vmatpush.msra.mxu2 %v1469_v50  ;;  %v381_v37 = vrot.slane %v356_v36, 1  ;;  %v1536_v39 = vld [vmem:[%s2990_s1 + $0x318] sm:$0xff]  ;;  %v1517_v42 = vld [vmem:[%s2990_s1 + $0x280] sm:$0xff]  ;;  %v1535_v43 = vld [vmem:[%s2990_s1 + $0x310] sm:$0xff] }
  0x38   : > { %467 = vmatpush.msrb.mxu0 %v1510_v40  ;;  %399 = vmatpush.msra.mxu3 %v1486_v51  ;;  %v1553_v40 = vld [vmem:[%s2990_s1 + $0x3a0] sm:$0xff]  ;;  %v1551_v45 = vld [vmem:[%s2990_s1 + $0x390] sm:$0xff]  ;;  %v1550_v47 = vld [vmem:[%s2990_s1 + $0x388] sm:$0xff] }
  0x39   : > { %517 = vmatpush.msrb.mxu1 %v1530_v53  ;;  %569 = vmatpush.msrb.mxu2 %v1548_v54  ;;  %v382_v41 = vsel %vm377_vm0, %v1957_v11, %v381_v37  ;;  %v1534_v11 = vld [vmem:[%s2990_s1 + $0x308] sm:$0xff]  ;;  %v1533_v46 = vld [vmem:[%s2990_s1 + $0x300] sm:$0xff]  ;;  %v1580_v54 = vld [vmem:[%s2990_s1 + $0x478] sm:$0xff] }
  0x3a   : > { %468 = vmatpush.msrb.mxu0 %v1509_v44  ;;  %400 = vmatpush.msra.mxu3 %v1485_v55  ;;  %v1552_v44 = vld [vmem:[%s2990_s1 + $0x398] sm:$0xff] }
  0x3b   : > { %518 = vmatpush.msrb.mxu1 %v1529_v57  ;;  %570 = vmatpush.msrb.mxu2 %v1547_v58  ;;  %v1572_v21 = vld [vmem:[%s2990_s1 + $0x438] sm:$0xff] }
  0x3c   : > { %469 = vmatpush.msrb.mxu0 %v1508_v48  ;;  %641 = vmatpush.msrb.mxu3 %v1564_v59  ;;  %v1549_v48 = vld [vmem:[%s2990_s1 + $0x380] sm:$0xff]  ;;  %v1578_v59 = vld [vmem:[%s2990_s1 + $0x468] sm:$0xff] }
  0x3d   : > { %292 = vmatmul.f32.vlgmr.msra.gmra.mxu1 %v1944_v4  ;;  %571 = vmatpush.msrb.mxu2 %v1546_v63  ;;  %v1503_v4 = vld [vmem:[%s2990_s1 + $0x210] sm:$0xff] }
  0x3e   : > { %470 = vmatpush.msrb.mxu0 %v1507_v52  ;;  %519 = vmatpush.msrb.mxu1 %v1528_v62 }
  0x3f   : > { %642 = vmatpush.msrb.mxu3 %v1563_v0  ;;  %572 = vmatpush.msrb.mxu2 %v1545_v1 }
  0x40   : > { %471 = vmatpush.msrb.mxu0 %v1506_v56  ;;  %401 = vmatmul.f32.vlgmr.msra.gmra.mxu3 %v380_v25  ;;  %v1579_v56 = vld [vmem:[%s2990_s1 + $0x470] sm:$0xff] }
  0x41   : > { %643 = vmatpush.msrb.mxu3 %v1562_v2  ;;  %573 = vmatpush.msrb.mxu2 %v1544_v7  ;;  %v1571_v25 = vld [vmem:[%s2990_s1 + $0x430] sm:$0xff] }
  0x42   : > { %472 = vmatpush.msrb.mxu0 %v1505_v60 }
  0x43   : > { %644 = vmatpush.msrb.mxu3 %v1561_v8  ;;  %574 = vmatpush.msrb.mxu2 %v1543_v12  ;;  %v1573_v12 = vld [vmem:[%s2990_s1 + $0x440] sm:$0xff] }
  0x44   : > { %473 = vmatpush.msrb.mxu0 %v1504_v61  ;;  %v1577_v61 = vld [vmem:[%s2990_s1 + $0x460] sm:$0xff] }
  0x45   : > { %295 = vmatmul.f32.gmra.mxu1 %v1948_v6  ;;  %v1527_v6 = vld [vmem:[%s2990_s1 + $0x2d0] sm:$0xff]  ;;  %645 = vmatpush.msrb.mxu3 %v1560_v13 }
  0x46   : > { %474 = vmatpush.msrb.mxu0 %v1503_v4  ;;  %520 = vmatpush.msrb.mxu1 %v1527_v6  ;;  %v1576_v6 = vld [vmem:[%s2990_s1 + $0x458] sm:$0xff] }
  0x47   : > { %575 = vmatpush.msrb.mxu2 %v1542_v15  ;;  %646 = vmatpush.msrb.mxu3 %v1559_v16 }
  0x48   : > { %475 = vmatpush.msrb.mxu0 %v1502_v3  ;;  %521 = vmatpush.msrb.mxu1 %v1526_v5  ;;  %v1575_v3 = vld [vmem:[%s2990_s1 + $0x450] sm:$0xff] }
  0x49   : > { %576 = vmatpush.msrb.mxu2 %v1541_v18  ;;  %647 = vmatpush.msrb.mxu3 %v1558_v19 }
  0x4a   : > { %476 = vmatpush.msrb.mxu0 %v1501_v9  ;;  %522 = vmatpush.msrb.mxu1 %v1525_v10  ;;  %v1574_v10 = vld [vmem:[%s2990_s1 + $0x448] sm:$0xff] }
  0x4b   : > { %577 = vmatpush.msrb.mxu2 %v1540_v23  ;;  %648 = vmatpush.msrb.mxu3 %v1557_v24 }
  0x4c   : > { %523 = vmatpush.msrb.mxu1 %v1524_v14  ;;  %404 = vmatmul.f32.gmra.mxu3 %v382_v41 }
  0x4d   : > { %578 = vmatpush.msrb.mxu2 %v1539_v27  ;;  %649 = vmatpush.msrb.mxu3 %v1556_v28 }
  0x4e   : > { %524 = vmatpush.msrb.mxu1 %v1523_v17 }
  0x4f   : > { %579 = vmatpush.msrb.mxu2 %v1538_v30  ;;  %650 = vmatpush.msrb.mxu3 %v1555_v31  ;;  %v1570_v30 = vld [vmem:[%s2990_s1 + $0x428] sm:$0xff] }
  0x50   : > { %525 = vmatpush.msrb.mxu1 %v1522_v22  ;;  %v540_v22 = vld [vmem:[%s1938_s26] sm:$0xfc] }
  0x51   : > { %580 = vmatpush.msrb.mxu2 %v1537_v33  ;;  %651 = vmatpush.msrb.mxu3 %v1554_v35  ;;  %v1569_v33 = vld [vmem:[%s2990_s1 + $0x420] sm:$0xff] }
  0x52   : > { %526 = vmatpush.msrb.mxu1 %v1521_v26 }
  0x53   : > { %581 = vmatpush.msrb.mxu2 %v1536_v39  ;;  %652 = vmatpush.msrb.mxu3 %v1553_v40  ;;  %v1568_v40 = vld [vmem:[%s2990_s1 + $0x418] sm:$0xff] }
  0x54   : > { %527 = vmatpush.msrb.mxu1 %v1520_v29  ;;  %v562_v29 = vrot.slane %v540_v22, 2 }
  0x55   : > { %582 = vmatpush.msrb.mxu2 %v1535_v43  ;;  %653 = vmatpush.msrb.mxu3 %v1552_v44 }
  0x56   : > { %528 = vmatpush.msrb.mxu1 %v1519_v32  ;;  %v564_v36 = vsel %vm561_vm1, %v562_v29, %v2000_v34 }
  0x57   : > { %583 = vmatpush.msrb.mxu2 %v1534_v11  ;;  %654 = vmatpush.msrb.mxu3 %v1551_v45  ;;  %v1567_v11 = vld [vmem:[%s2990_s1 + $0x410] sm:$0xff] }
  0x58   : > { %529 = vmatpush.msrb.mxu1 %v1518_v38 }
  0x59   : > { %584 = vmatpush.msrb.mxu2 %v1533_v46  ;;  %655 = vmatpush.msrb.mxu3 %v1550_v47 }
  0x5a   : > { %530 = vmatpush.msrb.mxu1 %v1517_v42  ;;  %v541_v42 = vld [vmem:[%s1938_s26 + $0x20] sm:$0x3] }
  0x5b   : > { %656 = vmatpush.msrb.mxu3 %v1549_v48  ;;  %v565_v47 = vrot.slane %v541_v42, 2  ;;  %v1566_v48 = vld [vmem:[%s2990_s1 + $0x408] sm:$0xff]  ;;  %v1628_v42 = vld [vmem:[%s2991_s2 + $0x1f8] sm:$0xff] }
  0x70   : > { %v1779_v50 = vpop.permute.xlu2 %1778 }
  0x71   : > { %v1781_v8 = vunpack.i.h.bf16 %v1779_v50  ;;  %v1780_v9 = vunpack.i.l.bf16 %v1779_v50  ;;  %v566_v50 = vsel %vm561_vm1, %v2000_v34, %v565_v47  ;;  %v1625_v47 = vld [vmem:[%s2991_s2 + $0x1e0] sm:$0xff] }
  0x73   : > { %v457_v16 = vsel %vm248_vm2, %v1780_v9, %v1781_v8 }
  0x78   : > { %v1784_v1 = vpop.permute.xlu2 %1783 }
  0x79   : > { %v1786_v27 = vunpack.i.h.bf16 %v1784_v1  ;;  %v1785_v28 = vunpack.i.l.bf16 %v1784_v1 }
  0x7b   : > { %v458_v37 = vsel %vm248_vm2, %v1785_v28, %v1786_v27 }
  0x80   : > { %v1799_v26 = vpop.permute.xlu2 %1798 }
  0x81   : > { %v1801_v31 = vunpack.i.h.bf16 %v1799_v26  ;;  %v1800_v32 = vunpack.i.l.bf16 %v1799_v26 }
  0x83   : > { %v638_v43 = vsel %vm248_vm2, %v1800_v32, %v1801_v31 }
  0x84   : > { %v1759_v49 = vpop.permute.xlu0 %1758 }
  0x85   : > { %v1761_v51 = vunpack.i.h.bf16 %v1759_v49  ;;  %v1760_v52 = vunpack.i.l.bf16 %v1759_v49  ;;  %v1769_v53 = vpop.permute.xlu1 %1768  ;;  %v1565_v49 = vld [vmem:[%s2990_s1 + $0x400] sm:$0xff] }
  0x86   : > { %v1771_v57 = vunpack.i.h.bf16 %v1769_v53  ;;  %v1770_v58 = vunpack.i.l.bf16 %v1769_v53 }
  0x87   : > { %v249_v55 = vsel %vm248_vm2, %v1760_v52, %v1761_v51 }
  0x88   : > { %269 = vmatmul.f32.vlgmr.msra.gmra.mxu0 %v249_v55  ;;  %v250_v4 = vsel %vm248_vm2, %v1770_v58, %v1771_v57  ;;  %v1814_v52 = vpop.permute.xlu2 %1813 }
  0x89   : > { %695 = vmatpush.msra.mxu0 %v1580_v54  ;;  %v1816_v53 = vunpack.i.h.bf16 %v1814_v52  ;;  %v1815_v54 = vunpack.i.l.bf16 %v1814_v52  ;;  %v813_v52 = vld [vmem:[%s2991_s2 + $0x40] sm:$0xff] }
  0x8b   : > { %696 = vmatpush.msra.mxu0 %v1579_v56  ;;  %v692_v55 = vsel %vm324_vm3, %v1815_v54, %v1816_v53 }
  0x8c   : > { %v1764_v60 = vpop.permute.xlu0 %1763 }
  0x8d   : > { %v1766_v62 = vunpack.i.h.bf16 %v1764_v60  ;;  %v1765_v63 = vunpack.i.l.bf16 %v1764_v60  ;;  %697 = vmatpush.msra.mxu0 %v1578_v59  ;;  %v1774_v0 = vpop.permute.xlu1 %1773 }
  0x8e   : > { %v1776_v5 = vunpack.i.h.bf16 %v1774_v0  ;;  %v1775_v7 = vunpack.i.l.bf16 %v1774_v0 }
  0x8f   : > { %v325_v2 = vsel %vm324_vm3, %v1765_v63, %v1766_v62  ;;  %698 = vmatpush.msra.mxu0 %v1577_v61 }
  0x90   : > { %272 = vmatmul.f32.gmra.mxu0 %v250_v4  ;;  %345 = vmatmul.f32.vlgmr.msra.gmra.mxu2 %v325_v2  ;;  %v326_v15 = vsel %vm324_vm3, %v1775_v7, %v1776_v5 }
  0x91   : > { %699 = vmatpush.msra.mxu0 %v1576_v6 }
  0x93   : > { %700 = vmatpush.msra.mxu0 %v1575_v3 }
  0x94   : > { %v1789_v13 = vpop.permute.xlu0 %1788 }
  0x95   : > { %701 = vmatpush.msra.mxu0 %v1574_v10  ;;  %v1794_v14 = vpop.permute.xlu1 %1793  ;;  %v1791_v17 = vunpack.i.h.bf16 %v1789_v13  ;;  %v1790_v18 = vunpack.i.l.bf16 %v1789_v13  ;;  %v198_v13 = vld [vmem:[%s2992_s3] sm:$0x3] }
  0x96   : > { %v1796_v19 = vunpack.i.h.bf16 %v1794_v14  ;;  %v1795_v20 = vunpack.i.l.bf16 %v1794_v14 }
  0x97   : > { %702 = vmatpush.msra.mxu0 %v1573_v12  ;;  %v637_v23 = vsel %vm248_vm2, %v1790_v18, %v1791_v17  ;;  %v720_v18 = vperm.slane %v198_v13, 0 }
  0x98   : > { %348 = vmatmul.f32.gmra.mxu2 %v326_v15  ;;  %477 = vmatmul.f32.vlgmr.msrb.gmra.mxu0 %v457_v16  ;;  %v511_v24 = vsel %vm324_vm3, %v1795_v20, %v1796_v19 }
  0x99   : > { %703 = vmatpush.msra.mxu0 %v1572_v21  ;;  %531 = vmatmul.f32.vlgmr.msrb.gmra.mxu1 %v511_v24 }
  0x9a   : > { %657 = vmatmul.f32.vlgmr.msrb.gmra.mxu3 %v637_v23 }
  0x9b   : > { %704 = vmatpush.msra.mxu0 %v1571_v25 }
  0x9c   : > { %v1804_v41 = vpop.permute.xlu0 %1803 }
  0x9d   : > { %705 = vmatpush.msra.mxu0 %v1570_v30  ;;  %v1809_v35 = vpop.permute.xlu1 %1808  ;;  %v1806_v45 = vunpack.i.h.bf16 %v1804_v41  ;;  %v1805_v46 = vunpack.i.l.bf16 %v1804_v41  ;;  %v818_v41 = vld [vmem:[%s2991_s2 + $0x68] sm:$0xff] }
  0x9e   : > { %v1811_v38 = vunpack.i.h.bf16 %v1809_v35  ;;  %v1810_v39 = vunpack.i.l.bf16 %v1809_v35 }
  0x9f   : > { %706 = vmatpush.msra.mxu0 %v1569_v33  ;;  %v691_v51 = vsel %vm324_vm3, %v1805_v46, %v1806_v45  ;;  %v816_v46 = vld [vmem:[%s2991_s2 + $0x58] sm:$0xff] }
  0xa0   : > { %585 = vmatmul.f32.vlgmr.msrb.gmra.mxu2 %v564_v36  ;;  %480 = vmatmul.f32.gmra.mxu0 %v458_v37  ;;  %v512_v44 = vsel %vm324_vm3, %v1810_v39, %v1811_v38  ;;  %v820_v39 = vld [vmem:[%s2991_s2 + $0x78] sm:$0xff] }
  0xa1   : > { %707 = vmatpush.msra.mxu0 %v1568_v40  ;;  %534 = vmatmul.f32.gmra.mxu1 %v512_v44  ;;  %v819_v40 = vld [vmem:[%s2991_s2 + $0x70] sm:$0xff]  ;;  %v817_v44 = vld [vmem:[%s2991_s2 + $0x60] sm:$0xff] }
  0xa2   : > { %660 = vmatmul.f32.gmra.mxu3 %v638_v43  ;;  %879 = vmatpush.msra.mxu2 %v820_v39  ;;  %v1627_v43 = vld [vmem:[%s2991_s2 + $0x1f0] sm:$0xff] }
  0xa3   : > { %708 = vmatpush.msra.mxu0 %v1567_v11  ;;  %v1626_v11 = vld [vmem:[%s2991_s2 + $0x1e8] sm:$0xff]  ;;  %v1611_v39 = vld [vmem:[%s2991_s2 + $0x170] sm:$0xff] }
  0xa4   : > { %880 = vmatpush.msra.mxu2 %v819_v40 }
  0xa5   : > { %709 = vmatpush.msra.mxu0 %v1566_v48  ;;  %v815_v48 = vld [vmem:[%s2991_s2 + $0x50] sm:$0xff] }
  0xa6   : > { %881 = vmatpush.msra.mxu2 %v818_v41 }
  0xa7   : > { %710 = vmatpush.msra.mxu0 %v1565_v49  ;;  %v1624_v49 = vld [vmem:[%s2991_s2 + $0x1d8] sm:$0xff] }
  0xa8   : > { %588 = vmatmul.f32.gmra.mxu2 %v566_v50  ;;  %711 = vmatmul.f32.vlgmr.msra.gmra.mxu0 %v691_v51  ;;  %v814_v50 = vld [vmem:[%s2991_s2 + $0x48] sm:$0xff]  ;;  %v1623_v51 = vld [vmem:[%s2991_s2 + $0x1d0] sm:$0xff] }
  0xa9   : > { %986 = vmatpush.msrb.mxu0 %v1628_v42  ;;  %882 = vmatpush.msra.mxu2 %v817_v44  ;;  %v1610_v42 = vld [vmem:[%s2991_s2 + $0x168] sm:$0xff]  ;;  %v1609_v44 = vld [vmem:[%s2991_s2 + $0x160] sm:$0xff] }
  0xab   : > { %987 = vmatpush.msrb.mxu0 %v1627_v43  ;;  %883 = vmatpush.msra.mxu2 %v816_v46  ;;  %v1596_v46 = vld [vmem:[%s2991_s2 + $0xf8] sm:$0xff] }
  0xac   : > { %856 = vmatpush.msra.mxu1 %v1596_v46 }
  0xad   : > { %988 = vmatpush.msrb.mxu0 %v1626_v11  ;;  %884 = vmatpush.msra.mxu2 %v815_v48  ;;  %v1608_v11 = vld [vmem:[%s2991_s2 + $0x158] sm:$0xff]  ;;  %v1606_v48 = vld [vmem:[%s2991_s2 + $0x148] sm:$0xff] }
  0xaf   : > { %989 = vmatpush.msrb.mxu0 %v1625_v47  ;;  %885 = vmatpush.msra.mxu2 %v814_v50  ;;  %v1595_v47 = vld [vmem:[%s2991_s2 + $0xf0] sm:$0xff]  ;;  %v1604_v50 = vld [vmem:[%s2991_s2 + $0x138] sm:$0xff] }
  0xb0   : > { %714 = vmatmul.f32.gmra.mxu0 %v692_v55  ;;  %v812_v55 = vld [vmem:[%s2991_s2 + $0x38] sm:$0xff]  ;;  %857 = vmatpush.msra.mxu1 %v1595_v47 }
  0xb1   : > { %990 = vmatpush.msrb.mxu0 %v1624_v49  ;;  %886 = vmatpush.msra.mxu2 %v813_v52  ;;  %v1605_v49 = vld [vmem:[%s2991_s2 + $0x140] sm:$0xff]  ;;  %v1603_v52 = vld [vmem:[%s2991_s2 + $0x130] sm:$0xff] }
  0xb3   : > { %991 = vmatpush.msrb.mxu0 %v1623_v51  ;;  %887 = vmatpush.msra.mxu2 %v812_v55 }
  0xba   : > { %v293_v57 = vpop.f32.mrf.mxu1 }
  0xc2   : > { %v296_v62 = vpop.f32.mrf.mxu1 }
  0xc3   : > { %v402_v59 = vpop.f32.mrf.mxu3 }
  0xcf   : > { %v405_v0 = vpop.f32.mrf.mxu3 }
 0x105   : > { %v270_v56 = vpop.f32.mrf.mxu0 }
 0x106   : > { %v294_v61 = vadd.f32 %v293_v57, %v270_v56  ;;  %v811_v56 = vld [vmem:[%s2991_s2 + $0x30] sm:$0xff]  ;;  %v810_v57 = vld [vmem:[%s2991_s2 + $0x28] sm:$0xff] }
 0x107   : > { %888 = vmatpush.msra.mxu2 %v811_v56  ;;  %v1601_v56 = vld [vmem:[%s2991_s2 + $0x120] sm:$0xff] }
 0x109   : > { %889 = vmatpush.msra.mxu2 %v810_v57 }
 0x10d   : > { %v273_v58 = vpop.f32.mrf.mxu0 }
 0x10e   : > { %v297_v1 = vadd.f32 %v296_v62, %v273_v58  ;;  %v809_v58 = vld [vmem:[%s2991_s2 + $0x20] sm:$0xff] }
 0x10f   : > { %890 = vmatpush.msra.mxu2 %v809_v58 }
 0x113   : > { %v346_v60 = vpop.f32.mrf.mxu2 }
 0x114   : > { %v352_v34 = vadd.f32 %v346_v60, %v294_v61 }
 0x115   : > { %v478_v63 = vpop.f32.mrf.mxu0 }
 0x116   : > { %v408_v4 = vadd.f32 %v402_v59, %v352_v34  ;;  %v532_v2 = vpop.f32.mrf.mxu1  ;;  %v1622_v34 = vld [vmem:[%s2991_s2 + $0x1c8] sm:$0xff] }
 0x117   : > { %992 = vmatpush.msrb.mxu0 %v1622_v34 }
 0x118   : > { %v484_v5 = vadd.f32 %v478_v63, %v408_v4  ;;  %v808_v63 = vld [vmem:[%s2991_s2 + $0x18] sm:$0xff]  ;;  %v1621_v4 = vld [vmem:[%s2991_s2 + $0x1c0] sm:$0xff] }
 0x119   : > { %891 = vmatpush.msra.mxu2 %v808_v63  ;;  %993 = vmatpush.msrb.mxu0 %v1621_v4  ;;  %v1599_v4 = vld [vmem:[%s2991_s2 + $0x110] sm:$0xff] }
 0x11a   : > { %v538_v9 = vadd.f32 %v532_v2, %v484_v5  ;;  %v805_v2 = vld [vmem:[%s2991_s2] sm:$0xff]  ;;  %v1618_v5 = vld [vmem:[%s2991_s2 + $0x1a8] sm:$0xff] }
 0x11b   : > { %v349_v6 = vpop.f32.mrf.mxu2 }
 0x11c   : > { %v353_v7 = vadd.f32 %v349_v6, %v297_v1  ;;  %v806_v6 = vld [vmem:[%s2991_s2 + $0x8] sm:$0xff]  ;;  %v1620_v1 = vld [vmem:[%s2991_s2 + $0x1b8] sm:$0xff] }
 0x11d   : > { %v481_v3 = vpop.f32.mrf.mxu0  ;;  %v658_v8 = vpop.f32.mrf.mxu3  ;;  %994 = vmatpush.msrb.mxu0 %v1620_v1 }
 0x11e   : > { %v409_v10 = vadd.f32 %v405_v0, %v353_v7  ;;  %v535_v19 = vpop.f32.mrf.mxu1  ;;  %v807_v0 = vld [vmem:[%s2991_s2 + $0x10] sm:$0xff]  ;;  %v1617_v7 = vld [vmem:[%s2991_s2 + $0x1a0] sm:$0xff] }
 0x11f   : > { %892 = vmatpush.msra.mxu2 %v807_v0 }
 0x120   : > { %v485_v16 = vadd.f32 %v481_v3, %v409_v10  ;;  %v1619_v3 = vld [vmem:[%s2991_s2 + $0x1b0] sm:$0xff]  ;;  %v1614_v10 = vld [vmem:[%s2991_s2 + $0x188] sm:$0xff] }
 0x121   : > { %893 = vmatpush.msra.mxu2 %v806_v6  ;;  %995 = vmatpush.msrb.mxu0 %v1619_v3 }
 0x122   : > { %v539_v21 = vadd.f32 %v535_v19, %v485_v16 }
 0x123   : > { %v586_v12 = vpop.f32.mrf.mxu2  ;;  %894 = vmatpush.msra.mxu2 %v805_v2  ;;  %996 = vmatpush.msrb.mxu0 %v1618_v5 }
 0x124   : > { %v592_v14 = vadd.f32 %v586_v12, %v538_v9  ;;  %v1615_v9 = vld [vmem:[%s2991_s2 + $0x190] sm:$0xff]  ;;  %v1613_v12 = vld [vmem:[%s2991_s2 + $0x180] sm:$0xff] }
 0x125   : > { %v712_v15 = vpop.f32.mrf.mxu0  ;;  %v661_v24 = vpop.f32.mrf.mxu3  ;;  %997 = vmatpush.msrb.mxu0 %v1617_v7 }
 0x126   : > { %v664_v17 = vadd.f32 %v658_v8, %v592_v14  ;;  %v1616_v8 = vld [vmem:[%s2991_s2 + $0x198] sm:$0xff] }
 0x127   : > { %998 = vmatpush.msrb.mxu0 %v1616_v8 }
 0x128   : > { %v718_v20 = vadd.f32 %v712_v15, %v664_v17 }
 0x129   : > { %999 = vmatpush.msrb.mxu0 %v1615_v9 }
 0x12a   : > { %v721_v22 = vadd.f32 %v720_v18, %v718_v20 }
 0x12b   : > { %v589_v23 = vpop.f32.mrf.mxu2  ;;  %1000 = vmatpush.msrb.mxu0 %v1614_v10  ;;  %v1594_v10 = vld [vmem:[%s2991_s2 + $0xe8] sm:$0xff] }
 0x12c   : > { %v723_v25 = vmax.f32 %v721_v22, 0.0  ;;  %v593_v26 = vadd.f32 %v589_v23, %v539_v21  ;;  %858 = vmatpush.msra.mxu1 %v1594_v10  ;;  %v1647_v10 = vld [vmem:[%s2991_s2 + $0x290] sm:$0xff] }
 0x12d   : > { %v715_v27 = vpop.f32.mrf.mxu0  ;;  %1001 = vmatpush.msrb.mxu0 %v1613_v12  ;;  %v1598_v12 = vld [vmem:[%s2991_s2 + $0x108] sm:$0xff] }
 0x12e   : > { %v665_v28 = vadd.f32 %v661_v24, %v593_v26  ;;  %v752_v29 = vrot.slane %v723_v25, 1  ;;  %v728_v30 = vrot.slane %v723_v25, 7 }
 0x130   : > { %v719_v31 = vadd.f32 %v715_v27, %v665_v28  ;;  %753 = vrot.lane.b32.xlu1 %v752_v29, %s1888_s13  ;;  %731 = vrot.lane.b32.xlu0 %v728_v30, %s1888_s13 }
 0x132   : > { %v722_v32 = vadd.f32 %v720_v18, %v719_v31 }
 0x134   : > { %v724_v33 = vmax.f32 %v722_v32, 0.0 }
 0x136   : > { %v758_v35 = vrot.slane %v724_v33, 6  ;;  %v729_v36 = vrot.slane %v724_v33, 7  ;;  %v1612_v33 = vld [vmem:[%s2991_s2 + $0x178] sm:$0xff] }
 0x137   : > { %931 = vmatpush.msra.mxu3 %v1612_v33  ;;  %v1675_v33 = vld [vmem:[%s2991_s2 + $0x370] sm:$0xff] }
 0x138   : > { %759 = vrot.lane.b32.xlu1 %v758_v35, %s1888_s13  ;;  %735 = vrot.lane.b32.xlu0 %v729_v36, %s1888_s13  ;;  %v730_v37 = vsel %vm727_vm4, %v728_v30, %v729_v36 }
 0x139   : > { %733 = vrot.lane.b32.xlu2 %v730_v37, %s1888_s13  ;;  %932 = vmatpush.msra.mxu3 %v1611_v39  ;;  %v1673_v39 = vld [vmem:[%s2991_s2 + $0x360] sm:$0xff] }
 0x13b   : > { %933 = vmatpush.msra.mxu3 %v1610_v42  ;;  %v1672_v42 = vld [vmem:[%s2991_s2 + $0x358] sm:$0xff] }
 0x13d   : > { %934 = vmatpush.msra.mxu3 %v1609_v44 }
 0x13f   : > { %935 = vmatpush.msra.mxu3 %v1608_v11  ;;  %v1671_v11 = vld [vmem:[%s2991_s2 + $0x350] sm:$0xff] }
 0x193   : > { %v734_v38 = vpop.permute.xlu2 %733 }
 0x194   : > { %745 = vst.msk [vmem:[#allocation2 + $0x10] sm:$0xff] %vm744_vm5, %v734_v38 }
 0x195   : > { %747 = vst.msk [vmem:[#allocation2 + $0x18] sm:$0xff] %vm746_vm6, %v734_v38 }
 0x19b   : > { %v765_v45 = vld [vmem:[#allocation2 + $0x10] sm:$0xff] }
 0x19c   : > { %772 = vrot.lane.b32.xlu0 %v765_v45, %s1887_s8  ;;  %v1607_v45 = vld [vmem:[%s2991_s2 + $0x150] sm:$0xff] }
 0x19d   : > { %936 = vmatpush.msra.mxu3 %v1607_v45  ;;  %v1643_v45 = vld [vmem:[%s2991_s2 + $0x270] sm:$0xff] }
 0x19f   : > { %937 = vmatpush.msra.mxu3 %v1606_v48  ;;  %v1655_v48 = vld [vmem:[%s2991_s2 + $0x2d0] sm:$0xff] }
 0x1a1   : > { %938 = vmatpush.msra.mxu3 %v1605_v49  ;;  %v1670_v49 = vld [vmem:[%s2991_s2 + $0x348] sm:$0xff] }
 0x1a2   : > { %v754_v53 = vpop.permute.xlu1 %753  ;;  %v732_v54 = vpop.permute.xlu0 %731 }
 0x1a3   : > { %756 = vst.msk [vmem:[#allocation2] sm:$0x1] %vm748_vm7, %v754_v53  ;;  %939 = vmatpush.msra.mxu3 %v1604_v50 }
 0x1a4   : > { %757 = vst.msk [vmem:[#allocation2 + $0x8] sm:$0x1] %vm750_vm8, %v754_v53  ;;  %v1602_v53 = vld [vmem:[%s2991_s2 + $0x128] sm:$0xff] }
 0x1a5   : > { %741 = vst.msk [vmem:[#allocation2] sm:$0xfe] %vm740_vm9, %v732_v54  ;;  %940 = vmatpush.msra.mxu3 %v1603_v52  ;;  %v1654_v52 = vld [vmem:[%s2991_s2 + $0x2c8] sm:$0xff] }
 0x1a6   : > { %743 = vst.msk [vmem:[#allocation2 + $0x8] sm:$0xfe] %vm742_vm10, %v732_v54 }
 0x1a7   : > { %941 = vmatpush.msra.mxu3 %v1602_v53  ;;  %v1669_v53 = vld [vmem:[%s2991_s2 + $0x340] sm:$0xff] }
 0x1a9   : > { %942 = vmatpush.msra.mxu3 %v1601_v56  ;;  %v1668_v56 = vld [vmem:[%s2991_s2 + $0x338] sm:$0xff] }
 0x1aa   : > { %v760_v59 = vpop.permute.xlu1 %759  ;;  %v736_v60 = vpop.permute.xlu0 %735 }
 0x1ab   : > { %762 = vst.msk [vmem:[#allocation2 + $0x21] sm:$0x1] %vm748_vm7, %v760_v59 }
 0x1ac   : > { %763 = vst.msk [vmem:[#allocation2 + $0x29] sm:$0x1] %vm750_vm8, %v760_v59  ;;  %v764_v61 = vld [vmem:[#allocation2] sm:$0xff]  ;;  %v1600_v59 = vld [vmem:[%s2991_s2 + $0x118] sm:$0xff] }
 0x1ad   : > { %749 = vst.msk [vmem:[#allocation2 + $0x20] sm:$0x1] %vm748_vm7, %v736_v60  ;;  %770 = vrot.lane.b32.xlu2 %v764_v61, %s1887_s8  ;;  %943 = vmatpush.msra.mxu3 %v1600_v59  ;;  %v1667_v59 = vld [vmem:[%s2991_s2 + $0x330] sm:$0xff] }
 0x1ae   : > { %751 = vst.msk [vmem:[#allocation2 + $0x28] sm:$0x1] %vm750_vm8, %v736_v60 }
 0x1af   : > { %944 = vmatpush.msra.mxu3 %v1599_v4  ;;  %v1665_v4 = vld [vmem:[%s2991_s2 + $0x320] sm:$0xff] }
 0x1b1   : > { %945 = vmatpush.msra.mxu3 %v1598_v12  ;;  %v1662_v12 = vld [vmem:[%s2991_s2 + $0x308] sm:$0xff] }
 0x1b4   : > { %v766_v62 = vld [vmem:[#allocation2 + $0x20] sm:$0x3] }
 0x1b5   : > { %774 = vrot.lane.b32.xlu1 %v766_v62, %s1887_s8 }
 0x207   : > { %v771_v13 = vpop.permute.xlu2 %770 }
 0x208   : > { %779 = vst.msk [vmem:[#allocation2] sm:$0xff] %vm746_vm6, %v771_v13 }
 0x20e   : > { %v773_v14 = vpop.permute.xlu0 %772 }
 0x20f   : > { %780 = vst.msk [vmem:[#allocation2 + $0x10] sm:$0xff] %vm746_vm6, %v773_v14  ;;  %v803_v15 = vld [vmem:[#allocation2] sm:$0xff] }
 0x210   : > { %895 = vmatmul.f32.vlgmr.msra.gmra.mxu2 %v803_v15  ;;  %789 = vrot.lane.b32.xlu2 %v803_v15, %s1889_s20  ;;  %v956_v16 = vld [vmem:[#allocation2] sm:$0xfe] }
 0x211   : > { %v979_v18 = vrot.slane %v956_v16, 1  ;;  %v1011_v30 = vld [vmem:[#allocation2] sm:$0xfe] }
 0x212   : > { %v1040_v36 = vrot.slane %v1011_v30, 1  ;;  %v1194_v9 = vld [vmem:[#allocation2] sm:$0xfc]  ;;  %v1583_v30 = vld [vmem:[%s2991_s2 + $0x90] sm:$0xff] }
 0x213   : > { %v1593_v14 = vld [vmem:[%s2991_s2 + $0xe0] sm:$0xff]  ;;  %v1219_v16 = vrot.slane %v1194_v9, 2  ;;  %v1635_v9 = vld [vmem:[%s2991_s2 + $0x230] sm:$0xff] }
 0x214   : > { %859 = vmatpush.msra.mxu1 %v1593_v14  ;;  %v1646_v14 = vld [vmem:[%s2991_s2 + $0x288] sm:$0xff] }
 0x216   : > { %v2563_v17 = vld [vmem:[#allocation2 + $0x10] sm:$0xff] }
 0x217   : > { %791 = vrot.lane.b32.xlu0 %v2563_v17, %s1889_s20  ;;  %v2567_v19 = vrot.slane %v2563_v17, 1  ;;  %v2634_v62 = vrot.slane %v2563_v17, 2 }
 0x218   : > { %898 = vmatmul.f32.gmra.mxu2 %v2563_v17 }
 0x219   : > { %v981_v20 = vsel %vm377_vm0, %v979_v18, %v2567_v19  ;;  %v1042_v40 = vsel %vm377_vm0, %v1040_v36, %v2567_v19  ;;  %v1592_v18 = vld [vmem:[%s2991_s2 + $0xd8] sm:$0xff]  ;;  %v1659_v36 = vld [vmem:[%s2991_s2 + $0x2f0] sm:$0xff] }
 0x21a   : > { %1002 = vmatmul.f32.vlgmr.msrb.gmra.mxu0 %v981_v20  ;;  %v1221_v20 = vsel %vm561_vm1, %v1219_v16, %v2634_v62  ;;  %860 = vmatpush.msra.mxu1 %v1592_v18  ;;  %v1633_v16 = vld [vmem:[%s2991_s2 + $0x220] sm:$0xff] }
 0x21b   : > { %v1645_v18 = vld [vmem:[%s2991_s2 + $0x280] sm:$0xff] }
 0x227   : > { %v775_v21 = vpop.permute.xlu1 %774 }
 0x228   : > { %782 = vst.msk [vmem:[#allocation2 + $0x20] sm:$0x3] %vm781_vm11, %v775_v21 }
 0x22f   : > { %v785_v22 = vld [vmem:[#allocation2 + $0x20] sm:$0x3] }
 0x230   : > { %v958_v23 = vld [vmem:[#allocation2 + $0x20] sm:$0x1]  ;;  %793 = vrot.lane.b32.xlu1 %v785_v22, %s1889_s20  ;;  %v1590_v22 = vld [vmem:[%s2991_s2 + $0xc8] sm:$0xff] }
 0x231   : > { %v982_v24 = vrot.slane %v958_v23, 1  ;;  %v1196_v54 = vld [vmem:[#allocation2 + $0x20] sm:$0x3]  ;;  %v1676_v23 = vld [vmem:[%s2991_s2 + $0x378] sm:$0xff] }
 0x232   : > { %v1015_v55 = vld [vmem:[#allocation2 + $0x20] sm:$0x1]  ;;  %v1225_v57 = vrot.slane %v1196_v54, 2 }
 0x233   : > { %v983_v25 = vsel %vm377_vm0, %v2567_v19, %v982_v24  ;;  %v1046_v58 = vrot.slane %v1015_v55, 1  ;;  %v1589_v24 = vld [vmem:[%s2991_s2 + $0xc0] sm:$0xff] }
 0x234   : > { %1005 = vmatmul.f32.gmra.mxu0 %v983_v25  ;;  %v1226_v6 = vsel %vm561_vm1, %v2634_v62, %v1225_v57  ;;  %v1588_v25 = vld [vmem:[%s2991_s2 + $0xb8] sm:$0xff]  ;;  %v1641_v54 = vld [vmem:[%s2991_s2 + $0x260] sm:$0xff] }
 0x235   : > { %v1047_v2 = vsel %vm377_vm0, %v2567_v19, %v1046_v58  ;;  %v1591_v19 = vld [vmem:[%s2991_s2 + $0xd0] sm:$0xff]  ;;  %v1653_v55 = vld [vmem:[%s2991_s2 + $0x2c0] sm:$0xff]  ;;  %v1640_v57 = vld [vmem:[%s2991_s2 + $0x258] sm:$0xff] }
 0x236   : > { %861 = vmatpush.msra.mxu1 %v1591_v19  ;;  %v1652_v58 = vld [vmem:[%s2991_s2 + $0x2b8] sm:$0xff] }
 0x237   : > { %v1632_v19 = vld [vmem:[%s2991_s2 + $0x218] sm:$0xff] }
 0x238   : > { %862 = vmatpush.msra.mxu1 %v1590_v22  ;;  %v1691_v22 = vld [vmem:[%s2991_s2 + $0x3f0] sm:$0xff] }
 0x23a   : > { %863 = vmatpush.msra.mxu1 %v1589_v24 }
 0x23c   : > { %864 = vmatpush.msra.mxu1 %v1588_v25 }
 0x26a   : > { %v790_v26 = vpop.permute.xlu2 %789 }
 0x26b   : > { %799 = vst.msk [vmem:[#allocation2 + $0x8] sm:$0xff] %vm798_vm12, %v790_v26  ;;  %v1587_v26 = vld [vmem:[%s2991_s2 + $0xb0] sm:$0xff] }
 0x26c   : > { %865 = vmatpush.msra.mxu1 %v1587_v26  ;;  %v1706_v26 = vld [vmem:[%s2991_s2 + $0x468] sm:$0xff] }
 0x272   : > { %v821_v27 = vld [vmem:[#allocation2 + $0x8] sm:$0xff] }
 0x273   : > { %v1822_v28 = vpack.i.bf16 %v821_v27, %v803_v15  ;;  %v1012_v31 = vld [vmem:[#allocation2 + $0x8] sm:$0xfe]  ;;  %v1597_v15 = vld [vmem:[%s2991_s2 + $0x100] sm:$0xff] }
 0x274   : > { %v1043_v37 = vrot.slane %v1012_v31, 1  ;;  %v1195_v8 = vld [vmem:[#allocation2 + $0x8] sm:$0xfc]  ;;  %946 = vmatpush.msra.mxu3 %v1597_v15  ;;  %v1661_v15 = vld [vmem:[%s2991_s2 + $0x300] sm:$0xff] }
 0x275   : > { %1823 = vrot.lane.b32.xlu0 %v1822_v28, %s1886_s5  ;;  %1818 = vrot.lane.b32.xlu2 %v1822_v28, %s1887_s8  ;;  %v1222_v13 = vrot.slane %v1195_v8, 2  ;;  %v1586_v27 = vld [vmem:[%s2991_s2 + $0xa8] sm:$0xff]  ;;  %v1585_v28 = vld [vmem:[%s2991_s2 + $0xa0] sm:$0xff] }
 0x276   : > { %1169 = vmatpush.msrb.mxu3 %v1676_v23  ;;  %866 = vmatpush.msra.mxu1 %v1586_v27  ;;  %v1582_v31 = vld [vmem:[%s2991_s2 + $0x88] sm:$0xff]  ;;  %v1663_v8 = vld [vmem:[%s2991_s2 + $0x310] sm:$0xff] }
 0x277   : > { %v1631_v23 = vld [vmem:[%s2991_s2 + $0x210] sm:$0xff] }
 0x278   : > { %867 = vmatpush.msra.mxu1 %v1585_v28  ;;  %1170 = vmatpush.msrb.mxu3 %v1675_v33  ;;  %v1690_v28 = vld [vmem:[%s2991_s2 + $0x3e8] sm:$0xff]  ;;  %v1629_v33 = vld [vmem:[%s2991_s2 + $0x200] sm:$0xff] }
 0x289   : > { %v792_v29 = vpop.permute.xlu0 %791 }
 0x28a   : > { %800 = vst.msk [vmem:[#allocation2 + $0x18] sm:$0xff] %vm798_vm12, %v792_v29  ;;  %v1584_v29 = vld [vmem:[%s2991_s2 + $0x98] sm:$0xff] }
 0x28b   : > { %868 = vmatpush.msra.mxu1 %v1584_v29  ;;  %v1705_v29 = vld [vmem:[%s2991_s2 + $0x460] sm:$0xff] }
 0x28d   : > { %869 = vmatpush.msra.mxu1 %v1583_v30  ;;  %v1630_v30 = vld [vmem:[%s2991_s2 + $0x208] sm:$0xff] }
 0x28f   : > { %870 = vmatpush.msra.mxu1 %v1582_v31  ;;  %v1689_v31 = vld [vmem:[%s2991_s2 + $0x3e0] sm:$0xff] }
 0x291   : > { %v2576_v32 = vld [vmem:[#allocation2 + $0x18] sm:$0xff] }
 0x292   : > { %v1827_v35 = vpack.i.bf16 %v2576_v32, %v2563_v17  ;;  %v1044_v38 = vrot.slane %v2576_v32, 1  ;;  %v1223_v63 = vrot.slane %v2576_v32, 2  ;;  %v1660_v32 = vld [vmem:[%s2991_s2 + $0x2f8] sm:$0xff] }
 0x293   : > { %1116 = vmatpush.msrb.mxu2 %v1660_v32  ;;  %v1704_v32 = vld [vmem:[%s2991_s2 + $0x458] sm:$0xff] }
 0x294   : > { %1828 = vrot.lane.b32.xlu1 %v1827_v35, %s1887_s8  ;;  %1833 = vrot.lane.b32.xlu2 %v1827_v35, %s1886_s5  ;;  %v1045_v41 = vsel %vm377_vm0, %v1043_v37, %v1044_v38  ;;  %v1224_v17 = vsel %vm561_vm1, %v1222_v13, %v1223_v63  ;;  %v1581_v35 = vld [vmem:[%s2991_s2 + $0x80] sm:$0xff]  ;;  %v1674_v37 = vld [vmem:[%s2991_s2 + $0x368] sm:$0xff] }
 0x295   : > { %v1837_v43 = vpack.i.bf16 %v1045_v41, %v1042_v40  ;;  %v1872_v21 = vpack.i.bf16 %v1224_v17, %v1221_v20  ;;  %871 = vmatpush.msra.mxu1 %v1581_v35  ;;  %1117 = vmatpush.msrb.mxu2 %v1659_v36  ;;  %v1657_v40 = vld [vmem:[%s2991_s2 + $0x2e0] sm:$0xff]  ;;  %v1644_v41 = vld [vmem:[%s2991_s2 + $0x278] sm:$0xff]  ;;  %v1634_v13 = vld [vmem:[%s2991_s2 + $0x228] sm:$0xff] }
 0x296   : > { %1171 = vmatpush.msrb.mxu3 %v1674_v37  ;;  %v1708_v17 = vld [vmem:[%s2991_s2 + $0x478] sm:$0xff]  ;;  %v1707_v20 = vld [vmem:[%s2991_s2 + $0x470] sm:$0xff] }
 0x297   : > { %1838 = vrot.lane.b32.xlu0 %v1837_v43, %s1887_s8  ;;  %1062 = vmatpush.msrb.mxu1 %v1644_v41  ;;  %v1688_v35 = vld [vmem:[%s2991_s2 + $0x3d8] sm:$0xff]  ;;  %v1703_v37 = vld [vmem:[%s2991_s2 + $0x450] sm:$0xff]  ;;  %v1702_v41 = vld [vmem:[%s2991_s2 + $0x448] sm:$0xff] }
 0x298   : > { %1172 = vmatpush.msrb.mxu3 %v1673_v39 }
 0x299   : > { %1063 = vmatpush.msrb.mxu1 %v1643_v45  ;;  %v1700_v45 = vld [vmem:[%s2991_s2 + $0x438] sm:$0xff] }
 0x29a   : > { %1173 = vmatpush.msrb.mxu3 %v1672_v42 }
 0x29c   : > { %1843 = vrot.lane.b32.xlu1 %v1837_v43, %s1886_s5  ;;  %v1656_v43 = vld [vmem:[%s2991_s2 + $0x2d8] sm:$0xff]  ;;  %1174 = vmatpush.msrb.mxu3 %v1671_v11  ;;  %v1685_v11 = vld [vmem:[%s2991_s2 + $0x3c0] sm:$0xff] }
 0x29e   : > { %1175 = vmatpush.msrb.mxu3 %v1670_v49  ;;  %v1698_v49 = vld [vmem:[%s2991_s2 + $0x428] sm:$0xff] }
 0x2a0   : > { %1176 = vmatpush.msrb.mxu3 %v1669_v53  ;;  %v1696_v53 = vld [vmem:[%s2991_s2 + $0x418] sm:$0xff] }
 0x2a2   : > { %v794_v51 = vpop.permute.xlu1 %793  ;;  %1177 = vmatpush.msrb.mxu3 %v1668_v56  ;;  %v1679_v56 = vld [vmem:[%s2991_s2 + $0x390] sm:$0xff] }
 0x2a3   : > { %802 = vst.msk [vmem:[#allocation2 + $0x28] sm:$0x3] %vm801_vm13, %v794_v51  ;;  %v1642_v51 = vld [vmem:[%s2991_s2 + $0x268] sm:$0xff] }
 0x2a4   : > { %1064 = vmatpush.msrb.mxu1 %v1642_v51  ;;  %1178 = vmatpush.msrb.mxu3 %v1667_v59  ;;  %v1697_v51 = vld [vmem:[%s2991_s2 + $0x420] sm:$0xff] }
 0x2a5   : > { %v1693_v59 = vld [vmem:[%s2991_s2 + $0x400] sm:$0xff] }
 0x2a6   : > { %1065 = vmatpush.msrb.mxu1 %v1641_v54  ;;  %v1680_v54 = vld [vmem:[%s2991_s2 + $0x398] sm:$0xff] }
 0x2a8   : > { %1066 = vmatpush.msrb.mxu1 %v1640_v57  ;;  %v1694_v57 = vld [vmem:[%s2991_s2 + $0x408] sm:$0xff] }
 0x2aa   : > { %v1197_v60 = vld [vmem:[#allocation2 + $0x28] sm:$0x3] }
 0x2ab   : > { %v1016_v61 = vld [vmem:[#allocation2 + $0x28] sm:$0x1]  ;;  %v1227_v34 = vrot.slane %v1197_v60, 2  ;;  %v1639_v60 = vld [vmem:[%s2991_s2 + $0x250] sm:$0xff] }
 0x2ac   : > { %v1048_v0 = vrot.slane %v1016_v61, 1  ;;  %v1651_v61 = vld [vmem:[%s2991_s2 + $0x2b0] sm:$0xff]  ;;  %1067 = vmatpush.msrb.mxu1 %v1639_v60  ;;  %v1677_v60 = vld [vmem:[%s2991_s2 + $0x380] sm:$0xff] }
 0x2ad   : > { %v1228_v1 = vsel %vm561_vm1, %v1223_v63, %v1227_v34  ;;  %v1666_v63 = vld [vmem:[%s2991_s2 + $0x328] sm:$0xff] }
 0x2ae   : > { %v1049_v3 = vsel %vm377_vm0, %v1044_v38, %v1048_v0  ;;  %v1857_v5 = vpack.i.bf16 %v1228_v1, %v1226_v6  ;;  %v1658_v38 = vld [vmem:[%s2991_s2 + $0x2e8] sm:$0xff]  ;;  %v1637_v6 = vld [vmem:[%s2991_s2 + $0x240] sm:$0xff]  ;;  %1179 = vmatpush.msrb.mxu3 %v1666_v63 }
 0x2af   : > { %v1852_v7 = vpack.i.bf16 %v1049_v3, %v1047_v2  ;;  %1118 = vmatpush.msrb.mxu2 %v1658_v38  ;;  %v1638_v34 = vld [vmem:[%s2991_s2 + $0x248] sm:$0xff]  ;;  %v1649_v1 = vld [vmem:[%s2991_s2 + $0x2a0] sm:$0xff]  ;;  %v1664_v2 = vld [vmem:[%s2991_s2 + $0x318] sm:$0xff] }
 0x2b0   : > { %1858 = vrot.lane.b32.xlu1 %v1857_v5, %s1886_s5  ;;  %v1650_v0 = vld [vmem:[%s2991_s2 + $0x2a8] sm:$0xff]  ;;  %1068 = vmatpush.msrb.mxu1 %v1638_v34  ;;  %v1636_v3 = vld [vmem:[%s2991_s2 + $0x238] sm:$0xff] }
 0x2b1   : > { %1853 = vrot.lane.b32.xlu0 %v1852_v7, %s1886_s5  ;;  %1848 = vrot.lane.b32.xlu2 %v1852_v7, %s1887_s8  ;;  %v1692_v7 = vld [vmem:[%s2991_s2 + $0x3f8] sm:$0xff] }
 0x2b2   : > { %1119 = vmatpush.msrb.mxu2 %v1657_v40  ;;  %1180 = vmatpush.msrb.mxu3 %v1665_v4  ;;  %v1687_v40 = vld [vmem:[%s2991_s2 + $0x3d0] sm:$0xff] }
 0x2b3   : > { %1069 = vmatpush.msrb.mxu1 %v1637_v6  ;;  %1241 = vmatpush.msra.mxu0 %v1692_v7 }
 0x2b4   : > { %1120 = vmatpush.msrb.mxu2 %v1656_v43  ;;  %1181 = vmatpush.msrb.mxu3 %v1664_v2  ;;  %v1686_v43 = vld [vmem:[%s2991_s2 + $0x3c8] sm:$0xff] }
 0x2b5   : > { %1070 = vmatpush.msrb.mxu1 %v1636_v3  ;;  %1242 = vmatpush.msra.mxu0 %v1691_v22  ;;  %v1141_v3 = vld [vmem:[#allocation2] sm:$0xfc] }
 0x2b6   : > { %1121 = vmatpush.msrb.mxu2 %v1655_v48  ;;  %1182 = vmatpush.msrb.mxu3 %v1663_v8  ;;  %v1683_v48 = vld [vmem:[%s2991_s2 + $0x3b0] sm:$0xff] }
 0x2b7   : > { %1071 = vmatpush.msrb.mxu1 %v1635_v9  ;;  %1243 = vmatpush.msra.mxu0 %v1690_v28 }
 0x2b8   : > { %1873 = vrot.lane.b32.xlu1 %v1872_v21, %s1887_s8  ;;  %1122 = vmatpush.msrb.mxu2 %v1654_v52  ;;  %v1681_v52 = vld [vmem:[%s2991_s2 + $0x3a0] sm:$0xff] }
 0x2b9   : > { %1868 = vrot.lane.b32.xlu0 %v1872_v21, %s1886_s5  ;;  %1863 = vrot.lane.b32.xlu2 %v1857_v5, %s1887_s8  ;;  %v1648_v5 = vld [vmem:[%s2991_s2 + $0x298] sm:$0xff] }
 0x2ba   : > { %1123 = vmatpush.msrb.mxu2 %v1653_v55  ;;  %1183 = vmatpush.msrb.mxu3 %v1662_v12  ;;  %v1695_v55 = vld [vmem:[%s2991_s2 + $0x410] sm:$0xff] }
 0x2bb   : > { %1072 = vmatpush.msrb.mxu1 %v1634_v13  ;;  %1244 = vmatpush.msra.mxu0 %v1689_v31 }
 0x2bc   : > { %1124 = vmatpush.msrb.mxu2 %v1652_v58  ;;  %1184 = vmatpush.msrb.mxu3 %v1661_v15  ;;  %v1678_v58 = vld [vmem:[%s2991_s2 + $0x388] sm:$0xff] }
 0x2bd   : > { %1073 = vmatpush.msrb.mxu1 %v1633_v16  ;;  %1245 = vmatpush.msra.mxu0 %v1688_v35  ;;  %v1142_v16 = vld [vmem:[#allocation2 + $0x20] sm:$0x3] }
 0x2be   : > { %1125 = vmatpush.msrb.mxu2 %v1651_v61 }
 0x2bf   : > { %1074 = vmatpush.msrb.mxu1 %v1632_v19  ;;  %1246 = vmatpush.msra.mxu0 %v1687_v40 }
 0x2c0   : > { %1126 = vmatpush.msrb.mxu2 %v1650_v0 }
 0x2c1   : > { %1075 = vmatpush.msrb.mxu1 %v1631_v23  ;;  %1247 = vmatpush.msra.mxu0 %v1686_v43 }
 0x2c2   : > { %1127 = vmatpush.msrb.mxu2 %v1649_v1 }
 0x2c3   : > { %1076 = vmatpush.msrb.mxu1 %v1630_v30  ;;  %1248 = vmatpush.msra.mxu0 %v1685_v11 }
 0x2c4   : > { %1128 = vmatpush.msrb.mxu2 %v1648_v5 }
 0x2c5   : > { %1077 = vmatpush.msrb.mxu1 %v1629_v33 }
 0x2c6   : > { %1129 = vmatpush.msrb.mxu2 %v1647_v10  ;;  %v1162_v10 = vrot.slane %v1141_v3, 2 }
 0x2c8   : > { %1130 = vmatpush.msrb.mxu2 %v1646_v14  ;;  %v1164_v15 = vsel %vm561_vm1, %v1162_v10, %v2634_v62 }
 0x2ca   : > { %1131 = vmatpush.msrb.mxu2 %v1645_v18  ;;  %v1165_v18 = vrot.slane %v1142_v16, 2  ;;  %v1320_v16 = vld [vmem:[%s1938_s26] sm:$0xfe] }
 0x2cc   : > { %1712 = vmatpush.msra.mxu2 %v1692_v7  ;;  %v1166_v19 = vsel %vm561_vm1, %v2634_v62, %v1165_v18 }
 0x2ce   : > { %1713 = vmatpush.msra.mxu2 %v1691_v22 }
 0x2cf   : > { %v1819_v44 = vpop.permute.xlu2 %1818 }
 0x2d0   : > { %v1821_v46 = vunpack.i.h.bf16 %v1819_v44  ;;  %v1820_v47 = vunpack.i.l.bf16 %v1819_v44  ;;  %1714 = vmatpush.msra.mxu2 %v1690_v28  ;;  %v1701_v44 = vld [vmem:[%s2991_s2 + $0x440] sm:$0xff] }
 0x2d2   : > { %v927_v50 = vsel %vm324_vm3, %v1820_v47, %v1821_v46  ;;  %1715 = vmatpush.msra.mxu2 %v1689_v31  ;;  %v1684_v46 = vld [vmem:[%s2991_s2 + $0x3b8] sm:$0xff]  ;;  %v1699_v47 = vld [vmem:[%s2991_s2 + $0x430] sm:$0xff] }
 0x2d3   : > { %947 = vmatmul.f32.vlgmr.msra.gmra.mxu3 %v927_v50  ;;  %v1682_v50 = vld [vmem:[%s2991_s2 + $0x3a8] sm:$0xff]  ;;  %1249 = vmatpush.msra.mxu0 %v1684_v46 }
 0x2d4   : > { %1728 = vmatpush.msra.mxu3 %v1708_v17  ;;  %1716 = vmatpush.msra.mxu2 %v1688_v35 }
 0x2d5   : > { %1250 = vmatpush.msra.mxu0 %v1683_v48 }
 0x2d6   : > { %1729 = vmatpush.msra.mxu3 %v1707_v20  ;;  %1717 = vmatpush.msra.mxu2 %v1687_v40  ;;  %v896_v40 = vpop.f32.mrf.mxu2 }
 0x2d7   : > { %1251 = vmatpush.msra.mxu0 %v1682_v50 }
 0x2d8   : > { %1730 = vmatpush.msra.mxu3 %v1706_v26  ;;  %1718 = vmatpush.msra.mxu2 %v1686_v43 }
 0x2d9   : > { %1252 = vmatpush.msra.mxu0 %v1681_v52 }
 0x2da   : > { %1731 = vmatpush.msra.mxu3 %v1705_v29  ;;  %1719 = vmatpush.msra.mxu2 %v1685_v11 }
 0x2db   : > { %1253 = vmatpush.msra.mxu0 %v1680_v54 }
 0x2dc   : > { %1732 = vmatpush.msra.mxu3 %v1704_v32  ;;  %1720 = vmatpush.msra.mxu2 %v1684_v46 }
 0x2dd   : > { %1254 = vmatpush.msra.mxu0 %v1679_v56 }
 0x2de   : > { %1733 = vmatpush.msra.mxu3 %v1703_v37  ;;  %1721 = vmatpush.msra.mxu2 %v1683_v48 }
 0x2df   : > { %1255 = vmatpush.msra.mxu0 %v1678_v58 }
 0x2e0   : > { %1734 = vmatpush.msra.mxu3 %v1702_v41  ;;  %1722 = vmatpush.msra.mxu2 %v1682_v50 }
 0x2e1   : > { %1256 = vmatpush.msra.mxu0 %v1677_v60 }
 0x2e2   : > { %1735 = vmatpush.msra.mxu3 %v1701_v44  ;;  %1723 = vmatpush.msra.mxu2 %v1681_v52 }
 0x2e4   : > { %1736 = vmatpush.msra.mxu3 %v1700_v45  ;;  %1724 = vmatpush.msra.mxu2 %v1680_v54 }
 0x2e6   : > { %1737 = vmatpush.msra.mxu3 %v1699_v47  ;;  %1725 = vmatpush.msra.mxu2 %v1679_v56 }
 0x2e7   : > { %v1824_v21 = vpop.permute.xlu0 %1823 }
 0x2e8   : > { %v1826_v24 = vunpack.i.h.bf16 %v1824_v21  ;;  %v1825_v25 = vunpack.i.l.bf16 %v1824_v21  ;;  %1738 = vmatpush.msra.mxu3 %v1698_v49  ;;  %1726 = vmatpush.msra.mxu2 %v1678_v58 }
 0x2ea   : > { %v852_v27 = vsel %vm248_vm2, %v1825_v25, %v1826_v24  ;;  %1739 = vmatpush.msra.mxu3 %v1697_v51  ;;  %1727 = vmatpush.msra.mxu2 %v1677_v60 }
 0x2eb   : > { %872 = vmatmul.f32.vlgmr.msra.gmra.mxu1 %v852_v27 }
 0x2ec   : > { %1295 = vmatpush.msra.mxu1 %v1708_v17  ;;  %1740 = vmatpush.msra.mxu3 %v1696_v53 }
 0x2ee   : > { %v1834_v36 = vpop.permute.xlu2 %1833  ;;  %1296 = vmatpush.msra.mxu1 %v1707_v20  ;;  %1741 = vmatpush.msra.mxu3 %v1695_v55 }
 0x2ef   : > { %v1836_v38 = vunpack.i.h.bf16 %v1834_v36  ;;  %v1835_v39 = vunpack.i.l.bf16 %v1834_v36 }
 0x2f0   : > { %1297 = vmatpush.msra.mxu1 %v1706_v26  ;;  %1742 = vmatpush.msra.mxu3 %v1694_v57 }
 0x2f1   : > { %v853_v42 = vsel %vm248_vm2, %v1835_v39, %v1836_v38 }
 0x2f2   : > { %1298 = vmatpush.msra.mxu1 %v1705_v29  ;;  %1743 = vmatpush.msra.mxu3 %v1693_v59 }
 0x2f3   : > { %875 = vmatmul.f32.gmra.mxu1 %v853_v42 }
 0x2f4   : > { %1299 = vmatpush.msra.mxu1 %v1704_v32 }
 0x2f6   : > { %1300 = vmatpush.msra.mxu1 %v1703_v37 }
 0x2f8   : > { %1301 = vmatpush.msra.mxu1 %v1702_v41 }
 0x2fa   : > { %1302 = vmatpush.msra.mxu1 %v1701_v44  ;;  %v899_v44 = vpop.f32.mrf.mxu2 }
 0x2fc   : > { %1303 = vmatpush.msra.mxu1 %v1700_v45 }
 0x2fe   : > { %1304 = vmatpush.msra.mxu1 %v1699_v47  ;;  %v1003_v47 = vpop.f32.mrf.mxu0 }
 0x300   : > { %1305 = vmatpush.msra.mxu1 %v1698_v49 }
 0x302   : > { %1306 = vmatpush.msra.mxu1 %v1697_v51 }
 0x304   : > { %1307 = vmatpush.msra.mxu1 %v1696_v53 }
 0x306   : > { %v1829_v61 = vpop.permute.xlu1 %1828  ;;  %1308 = vmatpush.msra.mxu1 %v1695_v55  ;;  %v1006_v53 = vpop.f32.mrf.mxu0 }
 0x307   : > { %v1831_v63 = vunpack.i.h.bf16 %v1829_v61  ;;  %v1830_v34 = vunpack.i.l.bf16 %v1829_v61 }
 0x308   : > { %1309 = vmatpush.msra.mxu1 %v1694_v57 }
 0x309   : > { %v1839_v0 = vpop.permute.xlu0 %1838  ;;  %v928_v4 = vsel %vm324_vm3, %v1830_v34, %v1831_v63 }
 0x30a   : > { %v1841_v6 = vunpack.i.h.bf16 %v1839_v0  ;;  %v1840_v1 = vunpack.i.l.bf16 %v1839_v0  ;;  %950 = vmatmul.f32.gmra.mxu3 %v928_v4  ;;  %1310 = vmatpush.msra.mxu1 %v1693_v59 }
 0x30b   : > { %v1849_v5 = vpop.permute.xlu2 %1848 }
 0x30c   : > { %v1112_v2 = vsel %vm324_vm3, %v1840_v1, %v1841_v6  ;;  %v1851_v12 = vunpack.i.h.bf16 %v1849_v5  ;;  %v1850_v13 = vunpack.i.l.bf16 %v1849_v5 }
 0x30d   : > { %1132 = vmatmul.f32.vlgmr.msrb.gmra.mxu2 %v1112_v2 }
 0x30e   : > { %v1844_v7 = vpop.permute.xlu1 %1843  ;;  %v1113_v17 = vsel %vm324_vm3, %v1850_v13, %v1851_v12  ;;  %v1877_v13 = vld [vmem:[%s2992_s3] sm:$0x3] }
 0x30f   : > { %v1846_v8 = vunpack.i.h.bf16 %v1844_v7  ;;  %v1845_v9 = vunpack.i.l.bf16 %v1844_v7 }
 0x311   : > { %v1058_v14 = vsel %vm248_vm2, %v1845_v9, %v1846_v8 }
 0x312   : > { %1078 = vmatmul.f32.vlgmr.msrb.gmra.mxu1 %v1058_v14  ;;  %1185 = vmatmul.f32.vlgmr.msrb.gmra.mxu3 %v1164_v15  ;;  %v1346_v14 = vperm.slane %v1877_v13, 1 }
 0x313   : > { %v1864_v20 = vpop.permute.xlu2 %1863 }
 0x314   : > { %v1866_v21 = vunpack.i.h.bf16 %v1864_v20  ;;  %v1865_v22 = vunpack.i.l.bf16 %v1864_v20 }
 0x315   : > { %1135 = vmatmul.f32.gmra.mxu2 %v1113_v17  ;;  %v1321_v17 = vld [vmem:[%s1938_s26 + $0x8] sm:$0xfe] }
 0x316   : > { %v1292_v23 = vsel %vm324_vm3, %v1865_v22, %v1866_v21 }
 0x31a   : > { %1188 = vmatmul.f32.gmra.mxu3 %v1166_v19 }
 0x322   : > { %v1859_v24 = vpop.permute.xlu1 %1858  ;;  %1314 = vmatmul.f32.vlgmr.msra.gmra.mxu3 %v1292_v23 }
 0x323   : > { %v1854_v25 = vpop.permute.xlu0 %1853  ;;  %v1861_v26 = vunpack.i.h.bf16 %v1859_v24  ;;  %v1860_v27 = vunpack.i.l.bf16 %v1859_v24 }
 0x324   : > { %v1856_v28 = vunpack.i.h.bf16 %v1854_v25  ;;  %v1855_v29 = vunpack.i.l.bf16 %v1854_v25  ;;  %v1324_v25 = vld [vmem:[%s1938_s26 + $0x20] sm:$0x1] }
 0x325   : > { %v1238_v31 = vsel %vm248_vm2, %v1860_v27, %v1861_v26 }
 0x326   : > { %v1059_v30 = vsel %vm248_vm2, %v1855_v29, %v1856_v28  ;;  %1260 = vmatmul.f32.vlgmr.msra.gmra.mxu2 %v1238_v31  ;;  %v1322_v28 = vld [vmem:[%s1938_s26 + $0x10] sm:$0xff]  ;;  %v1323_v29 = vld [vmem:[%s1938_s26 + $0x18] sm:$0xff] }
 0x327   : > { %1081 = vmatmul.f32.gmra.mxu1 %v1059_v30 }
 0x32a   : > { %v1874_v62 = vpop.permute.xlu1 %1873 }
 0x32b   : > { %v1869_v32 = vpop.permute.xlu0 %1868  ;;  %v1876_v33 = vunpack.i.h.bf16 %v1874_v62  ;;  %v1875_v35 = vunpack.i.l.bf16 %v1874_v62 }
 0x32c   : > { %v1871_v36 = vunpack.i.h.bf16 %v1869_v32  ;;  %v1870_v37 = vunpack.i.l.bf16 %v1869_v32 }
 0x32d   : > { %v1291_v39 = vsel %vm324_vm3, %v1875_v35, %v1876_v33  ;;  %v1325_v33 = vld [vmem:[%s1938_s26 + $0x28] sm:$0x1] }
 0x32e   : > { %v1237_v38 = vsel %vm248_vm2, %v1870_v37, %v1871_v36 }
 0x32f   : > { %1257 = vmatmul.f32.vlgmr.msra.gmra.mxu0 %v1237_v38  ;;  %1311 = vmatmul.f32.vlgmr.msra.gmra.mxu1 %v1291_v39 }
 0x356   : > { %v948_v41 = vpop.f32.mrf.mxu3 }
 0x368   : > { %v873_v42 = vpop.f32.mrf.mxu1 }
 0x369   : > { %v897_v48 = vadd.f32 %v896_v40, %v873_v42 }
 0x36b   : > { %v954_v51 = vadd.f32 %v948_v41, %v897_v48 }
 0x36d   : > { %v1009_v56 = vadd.f32 %v1003_v47, %v954_v51 }
 0x370   : > { %v876_v11 = vpop.f32.mrf.mxu1 }
 0x371   : > { %v900_v50 = vadd.f32 %v899_v44, %v876_v11 }
 0x38d   : > { %v951_v43 = vpop.f32.mrf.mxu3 }
 0x38e   : > { %v955_v52 = vadd.f32 %v951_v43, %v900_v50 }
 0x38f   : > { %v1079_v49 = vpop.f32.mrf.mxu1 }
 0x390   : > { %v1133_v45 = vpop.f32.mrf.mxu2  ;;  %v1010_v57 = vadd.f32 %v1006_v53, %v955_v52  ;;  %v1085_v59 = vadd.f32 %v1079_v49, %v1009_v56 }
 0x392   : > { %v1139_v63 = vadd.f32 %v1133_v45, %v1085_v59 }
 0x395   : > { %v1186_v46 = vpop.f32.mrf.mxu3 }
 0x396   : > { %v1192_v4 = vadd.f32 %v1186_v46, %v1139_v63 }
 0x398   : > { %v1136_v54 = vpop.f32.mrf.mxu2 }
 0x39d   : > { %v1189_v55 = vpop.f32.mrf.mxu3 }
 0x3a4   : > { %v1082_v58 = vpop.f32.mrf.mxu1 }
 0x3a5   : > { %v1086_v60 = vadd.f32 %v1082_v58, %v1010_v57  ;;  %v1315_v1 = vpop.f32.mrf.mxu3 }
 0x3a7   : > { %v1140_v61 = vadd.f32 %v1136_v54, %v1086_v60 }
 0x3a9   : > { %v1193_v34 = vadd.f32 %v1189_v55, %v1140_v61  ;;  %v1261_v0 = vpop.f32.mrf.mxu2 }
 0x3ab   : > { %v1265_v6 = vadd.f32 %v1261_v0, %v1193_v34 }
 0x3ac   : > { %v1258_v2 = vpop.f32.mrf.mxu0  ;;  %v1312_v7 = vpop.f32.mrf.mxu1 }
 0x3ad   : > { %v1319_v3 = vadd.f32 %v1315_v1, %v1265_v6  ;;  %v1264_v5 = vadd.f32 %v1258_v2, %v1192_v4 }
 0x3af   : > { %v1329_v8 = vrot.slane %v1319_v3, 7  ;;  %v1318_v9 = vadd.f32 %v1312_v7, %v1264_v5 }
 0x3b1   : > { %v1328_v10 = vrot.slane %v1318_v9, 7  ;;  %1335 = vrot.lane.b32.xlu1 %v1329_v8, %s1888_s13 }
 0x3b3   : > { %1331 = vrot.lane.b32.xlu2 %v1328_v10, %s1888_s13  ;;  %v1330_v12 = vsel %vm727_vm4, %v1328_v10, %v1329_v8 }
 0x3b4   : > { %1333 = vrot.lane.b32.xlu0 %v1330_v12, %s1888_s13 }
 0x3bb   : > { %1348 = vrot.lane.b32.xlu2 %v1346_v14, %s1888_s13  ;;  %s1711_s13 = sshll.u32 %s2995_s16, 4 }
 0x3bc   : > { %s197_s26 = scalar_lea.vmem %s2993_s4, %s1711_s13 }
 0x40d   : > { %v1332_v15 = vpop.permute.xlu2 %1331 }
 0x40e   : > { %v1340_v18 = vadd.f32 %v1332_v15, %v1320_v16  ;;  %v1341_v19 = vadd.f32 %v1332_v15, %v1321_v17 }
 0x415   : > { %v1349_v20 = vpop.permute.xlu2 %1348 }
 0x416   : > { %v1352_v21 = vadd.f32 %v1349_v20, %v1341_v19  ;;  %v1351_v22 = vadd.f32 %v1349_v20, %v1340_v18 }
 0x418   : > { %v1358_v23 = vmax.f32 %v1352_v21, 0.0  ;;  %v1357_v24 = vmax.f32 %v1351_v22, 0.0 }
 0x41a   : > { %1371 = vrot.lane.b32.xlu1 %v1358_v23, %s1886_s5  ;;  %1369 = vrot.lane.b32.xlu0 %v1357_v24, %s1886_s5 }
 0x423   : > { %v1336_v26 = vpop.permute.xlu1 %1335 }
 0x424   : > { %v1344_v27 = vadd.f32 %v1336_v26, %v1324_v25  ;;  %v1345_v38 = vadd.f32 %v1336_v26, %v1325_v33 }
 0x426   : > { %v1355_v30 = vadd.f32 %v1349_v20, %v1344_v27  ;;  %v1334_v31 = vpop.permute.xlu0 %1333  ;;  %v1356_v41 = vadd.f32 %v1349_v20, %v1345_v38 }
 0x427   : > { %v1342_v62 = vadd.f32 %v1334_v31, %v1322_v28  ;;  %v1343_v32 = vadd.f32 %v1334_v31, %v1323_v29 }
 0x428   : > { %v1361_v35 = vmax.f32 %v1355_v30, 0.0  ;;  %v1362_v42 = vmax.f32 %v1356_v41, 0.0 }
 0x429   : > { %v1353_v36 = vadd.f32 %v1349_v20, %v1342_v62  ;;  %v1354_v37 = vadd.f32 %v1349_v20, %v1343_v32 }
 0x42a   : > { %1377 = vrot.lane.b32.xlu1 %v1361_v35, %s1886_s5 }
 0x42b   : > { %v1360_v39 = vmax.f32 %v1354_v37, 0.0  ;;  %v1359_v40 = vmax.f32 %v1353_v36, 0.0 }
 0x42d   : > { %1375 = vrot.lane.b32.xlu0 %v1360_v39, %s1886_s5  ;;  %1373 = vrot.lane.b32.xlu2 %v1359_v40, %s1886_s5 }
 0x435   : > { %1379 = vrot.lane.b32.xlu2 %v1362_v42, %s1886_s5 }
 0x487   : > { %v1374_v45 = vpop.permute.xlu2 %1373 }
 0x48c   : > { %v1372_v43 = vpop.permute.xlu1 %1371  ;;  %v1370_v44 = vpop.permute.xlu0 %1369 }
 0x48d   : > { %v1381_v11 = vsel %vm248_vm2, %v1370_v44, %v1372_v43 }
 0x48e   : > { %1387 = vst [vmem:[%s197_s26 - $0x1] sm:$0xfe] %v1381_v11 }
 0x48f   : > { %v1380_v46 = vpop.permute.xlu2 %1379 }
 0x49c   : > { %v1378_v47 = vpop.permute.xlu1 %1377 }
 0x49d   : > { %v1383_v48 = vsel %vm248_vm2, %v1378_v47, %v1380_v46 }
 0x49e   : > { %1389 = vst [vmem:[%s197_s26 + $0xf] sm:$0x1] %v1383_v48 }
 0x49f   : > { %v1376_v49 = vpop.permute.xlu0 %1375 }
 0x4a0   : > { %v1382_v50 = vsel %vm248_vm2, %v1374_v45, %v1376_v49 }
 0x4a1   : > { %1388 = vst [vmem:[%s197_s26 + $0x7] sm:$0xff] %v1382_v50 }
 0x4a2 PF: > { %s14_s15 = sadd.s32 1, %s1884_s15  }
 0x4a3   : > { %p11_p4 = scmp.ge.s32.totalorder %s14_s15, 4  }
 0x4a5   :  { %13 = sbr.rel (!%p11_p4) target bundleno = 1 (0x1), region = 82 }

</bundles_post_ra>
